<compile_context>
chip_gen: v6e
topology: v6e:2x2x1
jax: 0.10.0
libtpu: 0.0.40
codegen_flags: <defaults>
</compile_context>

<pallas_src>
import functools

import jax
import jax.numpy as jnp
import numpy as np
from jax.experimental import pallas as pl
from jax.experimental.pallas import tpu as pltpu


def _round_up(x, m):
    return (x + m - 1) // m * m


# ----------------------------------------------------------------------------
# Fused Pallas kernel: 2 layers x 2 directions, whole sequence, one invocation.
# ----------------------------------------------------------------------------
def _fused_bilstm_kernel(x_ref, wx1_ref, wh1_ref, b1_ref,
                         wx2_ref, wh2_ref, b2_ref, out_ref, *, T, B, H, G):
    """x_ref:   (T*B, F0)  time-major input (B already padded to a multiple of 8)
       wx{l}:   (F_l, 4G)  bf16 stacked W_ih^T, gate groups [i | f | o | g], each group
                           128 lanes = [fw(H) | bw(H) | zero-pad]
       wh{l}:   (G, 4G)    bf16 block-diagonal stacked W_hh^T (fw rows->fw cols, bw rows->bw cols)
       b{l}:    (1, 4G)    f32, b_ih + b_hh in the same layout (padding lanes zero)
       out_ref: (B, G)     f32; lanes [0:2H] = lstm_out[:, -1, :] = [h_fw(T-1) | h_bw(T-1)]
    """
    SP = G                                   # padded state width (lanes)
    NG = 4 * G                               # fused gate width

    lane_g = jax.lax.broadcasted_iota(jnp.int32, (B, NG), 1) % G
    is_fw_col = lane_g < H                   # within each gate group: lanes [0:H] = forward dir
    lane_s = jax.lax.broadcasted_iota(jnp.int32, (B, SP), 1)
    is_fw_half = lane_s < H                  # state lanes [0:H] = forward hidden

    def run_layer(x2d, wx, wh, b):
        # Hoisted input projection + bias: one MXU dot covering all T steps, both directions.
        gx = jnp.dot(x2d.astype(wx.dtype), wx,
                     preferred_element_type=jnp.float32) + b          # (T*B, 4G) f32
        # Pair fw(x_t) with bw(x_{T-1-t}) for each loop step (off the serial chain).
        gx_pairs = [
            jnp.where(is_fw_col,
                      gx[t * B:(t + 1) * B, :],
                      gx[(T - 1 - t) * B:(T - t) * B, :])
            for t in range(T)
        ]

        h = jnp.zeros((B, SP), jnp.float32)   # [h_fw | h_bw | 0-pad]
        c = jnp.zeros((B, SP), jnp.float32)
        hs = []
        for t in range(T):                    # T == 4: fully unrolled serial recurrence
            gates = gx_pairs[t] + jnp.dot(h.astype(wh.dtype), wh,
                                          preferred_element_type=jnp.float32)
            sig = jax.nn.sigmoid(gates[:, 0:3 * G])       # i | f | o in one contiguous region
            i_g = sig[:, 0 * G:1 * G]
            f_g = sig[:, 1 * G:2 * G]
            o_g = sig[:, 2 * G:3 * G]
            g_g = jnp.tanh(gates[:, 3 * G:4 * G])
            c = f_g * c + i_g * g_g
            h = o_g * jnp.tanh(c)
            hs.append(h)                      # hs[t] = [h_fw(time t) | h_bw(time T-1-t) | 0]
        return hs

    hs1 = run_layer(x_ref[...], wx1_ref[...], wh1_ref[...], b1_ref[...])

    # Layer-2 input, time-major (T*B, G): row-block t = [h1_fw(t) | h1_bw(t) | 0].
    # With B padded to 8 every block is a whole (8,128) tile, so this is a cheap tile stack.
    x2 = jnp.concatenate(
        [jnp.where(is_fw_half, hs1[t], hs1[T - 1 - t]) for t in range(T)], axis=0)

    hs2 = run_layer(x2, wx2_ref[...], wh2_ref[...], b2_ref[...])

    # lstm_out[:, -1, :] = [fw hidden after step T-1 | bw hidden for orig time T-1 (loop step 0)]
    out_ref[...] = jnp.where(is_fw_half, hs2[T - 1], hs2[0])


# ----------------------------------------------------------------------------
# Parameter init (PyTorch-style) and ONE-TIME fused repack.
# ----------------------------------------------------------------------------
def init_lstm_params(key, input_dim, hidden_dim, num_layers=2):
    """PyTorch-style uniform(-1/sqrt(H), 1/sqrt(H)) init, per layer / direction."""
    k = 1.0 / np.sqrt(hidden_dim)
    params = []
    for layer in range(num_layers):
        in_dim = input_dim if layer == 0 else 2 * hidden_dim
        layer_p = {}
        for direction in ("fw", "bw"):
            key, k1, k2, k3, k4 = jax.random.split(key, 5)
            layer_p[direction] = dict(
                w_ih=jax.random.uniform(k1, (4 * hidden_dim, in_dim), jnp.float32, -k, k),
                w_hh=jax.random.uniform(k2, (4 * hidden_dim, hidden_dim), jnp.float32, -k, k),
                b_ih=jax.random.uniform(k3, (4 * hidden_dim,), jnp.float32, -k, k),
                b_hh=jax.random.uniform(k4, (4 * hidden_dim,), jnp.float32, -k, k),
            )
        params.append(layer_p)
    return params


def prepare_fused_params(params, hidden_dim, compute_dtype=jnp.bfloat16):
    """One-time repack (outside the per-forward path):
       * transpose W_ih / W_hh, fold b_ih + b_hh,
       * stack fw/bw into 128-lane-padded per-gate groups (vreg aligned),
       * reorder gate groups to [i | f | o | g] (sigmoid gates contiguous),
       * embed W_hh block-diagonally so one matmul drives both recurrences,
       * cast weight matrices to bf16 for the MXU (biases stay f32)."""
    H = hidden_dim
    G = _round_up(2 * H, 128)                 # padded per-gate group width
    SP = G                                    # padded state width
    gate_order = (0, 1, 3, 2)                 # PyTorch (i,f,g,o) -> fused (i,f,o,g)
    fused = []
    for layer_idx, lp in enumerate(params):
        fw, bw = lp["fw"], lp["bw"]
        in_dim = fw["w_ih"].shape[1]
        wx_rows = in_dim if layer_idx == 0 else SP   # layer>=1 input is the padded state layout
        wx = np.zeros((wx_rows, 4 * G), np.float32)
        wh = np.zeros((SP, 4 * G), np.float32)
        b = np.zeros((1, 4 * G), np.float32)

        wih_fw_t = np.asarray(fw["w_ih"]).T           # (in_dim, 4H)
        wih_bw_t = np.asarray(bw["w_ih"]).T
        whh_fw_t = np.asarray(fw["w_hh"]).T           # (H, 4H)
        whh_bw_t = np.asarray(bw["w_hh"]).T
        b_fw = np.asarray(fw["b_ih"]) + np.asarray(fw["b_hh"])
        b_bw = np.asarray(bw["b_ih"]) + np.asarray(bw["b_hh"])

        for q, s in enumerate(gate_order):
            col0 = q * G
            sl = slice(s * H, (s + 1) * H)
            wx[:in_dim, col0:col0 + H] = wih_fw_t[:, sl]
            wx[:in_dim, col0 + H:col0 + 2 * H] = wih_bw_t[:, sl]
            wh[0:H, col0:col0 + H] = whh_fw_t[:, sl]
            wh[H:2 * H, col0 + H:col0 + 2 * H] = whh_bw_t[:, sl]
            b[0, col0:col0 + H] = b_fw[sl]
            b[0, col0 + H:col0 + 2 * H] = b_bw[sl]

        fused.append(dict(
            wx=jnp.asarray(wx, dtype=compute_dtype),      # (F_l or SP, 4G) bf16
            wh=jnp.asarray(wh, dtype=compute_dtype),      # (SP, 4G)        bf16
            b=jnp.asarray(b, dtype=jnp.float32),          # (1, 4G)         f32
        ))
    return fused


# ----------------------------------------------------------------------------
# Forward pass reproducing LSTMFeatureExtractor.forward (eval mode)
# ----------------------------------------------------------------------------
def lstm_feature_extractor_forward(x, fused_params, hidden_dim, seq_len=4):
    B, feat = x.shape
    if feat % seq_len != 0:
        x = jnp.pad(x, ((0, 0), (0, seq_len - feat % seq_len)))
    F0 = x.shape[1] // seq_len
    H = hidden_dim
    G = _round_up(2 * H, 128)
    B_pad = max(8, _round_up(B, 8))           # fill the 8-sublane dimension of every vreg

    # Time-major (T, B_pad, F0) -> (T*B_pad, F0): every timestep is a whole sublane tile block.
    x_tm = x.astype(jnp.float32).reshape(B, seq_len, F0).transpose(1, 0, 2)
    if B_pad != B:
        x_tm = jnp.pad(x_tm, ((0, 0), (0, B_pad - B), (0, 0)))
    x_tm = x_tm.reshape(seq_len * B_pad, F0)

    p1, p2 = fused_params
    kernel = functools.partial(_fused_bilstm_kernel, T=seq_len, B=B_pad, H=H, G=G)
    out_pad = pl.pallas_call(
        kernel,
        out_shape=jax.ShapeDtypeStruct((B_pad, G), jnp.float32),     # lane-dense (8,128) slab
        in_specs=[pl.BlockSpec(memory_space=pltpu.MemorySpace.VMEM)] * 7,
        out_specs=pl.BlockSpec(memory_space=pltpu.MemorySpace.VMEM),
    )(x_tm, p1["wx"], p1["wh"], p1["b"], p2["wx"], p2["wh"], p2["b"])
    # TODO(synk): nn.Dropout and inter-layer LSTM dropout are identity in eval mode; no
    # stochastic dropout is applied here.
    return out_pad[:B, :2 * H]


# ----------------------------------------------------------------------------
# Pure-JAX f32 reference (same math, per-direction weights) for a sanity check.
# ----------------------------------------------------------------------------
def _ref_direction(x_seq, w_ih, w_hh, b_ih, b_hh):
    B, T, _ = x_seq.shape
    H = w_hh.shape[1]
    h = jnp.zeros((B, H), jnp.float32)
    c = jnp.zeros((B, H), jnp.float32)
    outs = []
    for t in range(T):
        g = x_seq[:, t, :] @ w_ih.T + h @ w_hh.T + b_ih + b_hh
        i = jax.nn.sigmoid(g[:, 0 * H:1 * H])
        f = jax.nn.sigmoid(g[:, 1 * H:2 * H])
        gg = jnp.tanh(g[:, 2 * H:3 * H])
        o = jax.nn.sigmoid(g[:, 3 * H:4 * H])
        c = f * c + i * gg
        h = o * jnp.tanh(c)
        outs.append(h)
    return jnp.stack(outs, axis=1)


def _ref_forward(x, params, seq_len=4):
    B, feat = x.shape
    if feat % seq_len != 0:
        x = jnp.pad(x, ((0, 0), (0, seq_len - feat % seq_len)))
    x_seq = x.reshape(B, seq_len, -1)
    layer_in = x_seq
    for lp in params:
        fw = _ref_direction(layer_in, lp["fw"]["w_ih"], lp["fw"]["w_hh"],
                            lp["fw"]["b_ih"], lp["fw"]["b_hh"])
        bw = _ref_direction(layer_in[:, ::-1, :], lp["bw"]["w_ih"], lp["bw"]["w_hh"],
                            lp["bw"]["b_ih"], lp["bw"]["b_hh"])[:, ::-1, :]
        layer_in = jnp.concatenate([fw, bw], axis=-1)
    return layer_in[:, -1, :]


if __name__ == "__main__":
    key = jax.random.PRNGKey(0)
    k_x, k_p = jax.random.split(key)

    batch = 2
    features = 62        # not divisible by 4 -> exercises the F.pad path (pads to 64)
    seq_len = 4
    step_dim = 16        # padded features // seq_len; must equal the LSTM input_size (as in PyTorch)
    hidden_dim = 32
    num_layers = 2

    x = jax.random.normal(k_x, (batch, features), dtype=jnp.float32)
    params = init_lstm_params(k_p, step_dim, hidden_dim, num_layers)
    fused_params = prepare_fused_params(params, hidden_dim)     # one-time weight repack (bf16)

    fwd = jax.jit(functools.partial(lstm_feature_extractor_forward,
                                    hidden_dim=hidden_dim, seq_len=seq_len))
    out = jax.block_until_ready(fwd(x, fused_params))

    ref = jax.block_until_ready(_ref_forward(x, params, seq_len=seq_len))
    assert out.shape == (batch, 2 * hidden_dim), out.shape
    # bf16 MXU operands vs f32 reference -> loosened tolerance (review correctness note).
    np.testing.assert_allclose(np.asarray(out), np.asarray(ref), rtol=2.5e-2, atol=2.5e-2)

    print("KERNEL_OK")
</pallas_src>

<mosaic_0001>
module attributes {stable_mosaic.version = 11 : i64} {
  func.func @_fused_bilstm_kernel(%arg0: memref<32x16xf32, #tpu.memory_space<vmem>>, %arg1: memref<16x512xbf16, #tpu.memory_space<vmem>>, %arg2: memref<128x512xbf16, #tpu.memory_space<vmem>>, %arg3: memref<1x512xf32, #tpu.memory_space<vmem>>, %arg4: memref<128x512xbf16, #tpu.memory_space<vmem>>, %arg5: memref<128x512xbf16, #tpu.memory_space<vmem>>, %arg6: memref<1x512xf32, #tpu.memory_space<vmem>>, %arg7: memref<8x128xf32, #tpu.memory_space<vmem>>) attributes {dimension_semantics = [], scalar_prefetch = 0 : i64, scratch_operands = 0 : i64, tpu.core_type = #tpu.core_type<tc>} {
    %0 = tpu.iota {dimensions = array<i32: 1>} : vector<8x512xi32>
    %c128_i32 = arith.constant 128 : i32
    %c0_i32 = arith.constant 0 : i32
    %1 = arith.cmpi eq, %c128_i32, %c0_i32 : i32
    %c1_i32 = arith.constant 1 : i32
    %2 = arith.select %1, %c1_i32, %c128_i32 : i32
    %3 = vector.broadcast %2 : i32 to vector<8x512xi32>
    %4 = arith.remsi %0, %3 : vector<8x512xi32>
    %c0_i32_0 = arith.constant 0 : i32
    %5 = vector.broadcast %c0_i32_0 : i32 to vector<8x512xi32>
    %6 = arith.cmpi ne, %4, %5 : vector<8x512xi32>
    %c0_i32_1 = arith.constant 0 : i32
    %7 = vector.broadcast %c0_i32_1 : i32 to vector<8x512xi32>
    %8 = arith.cmpi slt, %4, %7 : vector<8x512xi32>
    %c0_i32_2 = arith.constant 0 : i32
    %9 = arith.cmpi slt, %2, %c0_i32_2 : i32
    %10 = vector.broadcast %9 : i1 to vector<8x512xi1>
    %11 = vector.broadcast %10 : vector<8x512xi1> to vector<8x512xi1>
    %12 = arith.xori %8, %11 : vector<8x512xi1>
    %13 = arith.andi %12, %6 : vector<8x512xi1>
    %14 = vector.broadcast %2 : i32 to vector<8x512xi32>
    %15 = arith.addi %4, %14 : vector<8x512xi32>
    %16 = arith.select %13, %15, %4 : vector<8x512xi1>, vector<8x512xi32>
    %c32_i32 = arith.constant 32 : i32
    %17 = vector.broadcast %c32_i32 : i32 to vector<8x512xi32>
    %18 = arith.cmpi slt, %16, %17 : vector<8x512xi32>
    %19 = tpu.iota {dimensions = array<i32: 1>} : vector<8x128xi32>
    %c32_i32_3 = arith.constant 32 : i32
    %20 = vector.broadcast %c32_i32_3 : i32 to vector<8x128xi32>
    %21 = arith.cmpi slt, %19, %20 : vector<8x128xi32>
    %c0 = arith.constant 0 : index
    %c0_4 = arith.constant 0 : index
    %22 = vector.load %arg0[%c0, %c0_4] : memref<32x16xf32, #tpu.memory_space<vmem>>, vector<32x16xf32>
    %c0_5 = arith.constant 0 : index
    %c0_6 = arith.constant 0 : index
    %23 = vector.load %arg1[%c0_5, %c0_6] : memref<16x512xbf16, #tpu.memory_space<vmem>>, vector<16x512xbf16>
    %c0_7 = arith.constant 0 : index
    %c0_8 = arith.constant 0 : index
    %24 = vector.load %arg2[%c0_7, %c0_8] : memref<128x512xbf16, #tpu.memory_space<vmem>>, vector<128x512xbf16>
    %c0_9 = arith.constant 0 : index
    %c0_10 = arith.constant 0 : index
    %25 = vector.load %arg3[%c0_9, %c0_10] : memref<1x512xf32, #tpu.memory_space<vmem>>, vector<1x512xf32>
    %26 = arith.truncf %22 : vector<32x16xf32> to vector<32x16xbf16>
    %cst = arith.constant dense<0.000000e+00> : vector<32x512xf32>
    %27 = tpu.matmul %26, %23, %cst {dimension_numbers = #tpu.dot_dimension_numbers<[1], [0], [0], [1], [0, 0, 1, 1], [], []>} : vector<32x16xbf16>, vector<16x512xbf16>, vector<32x512xf32> -> vector<32x512xf32>
    %28 = vector.broadcast %25 : vector<1x512xf32> to vector<32x512xf32>
    %29 = arith.addf %27, %28 : vector<32x512xf32>
    %30 = vector.extract_strided_slice %29 {offsets = [0, 0], sizes = [8, 512], strides = [1, 1]} : vector<32x512xf32> to vector<8x512xf32>
    %31 = vector.extract_strided_slice %29 {offsets = [24, 0], sizes = [8, 512], strides = [1, 1]} : vector<32x512xf32> to vector<8x512xf32>
    %32 = arith.select %18, %30, %31 : vector<8x512xi1>, vector<8x512xf32>
    %33 = vector.extract_strided_slice %29 {offsets = [8, 0], sizes = [8, 512], strides = [1, 1]} : vector<32x512xf32> to vector<8x512xf32>
    %34 = vector.extract_strided_slice %29 {offsets = [16, 0], sizes = [8, 512], strides = [1, 1]} : vector<32x512xf32> to vector<8x512xf32>
    %35 = arith.select %18, %33, %34 : vector<8x512xi1>, vector<8x512xf32>
    %36 = vector.extract_strided_slice %29 {offsets = [16, 0], sizes = [8, 512], strides = [1, 1]} : vector<32x512xf32> to vector<8x512xf32>
    %37 = vector.extract_strided_slice %29 {offsets = [8, 0], sizes = [8, 512], strides = [1, 1]} : vector<32x512xf32> to vector<8x512xf32>
    %38 = arith.select %18, %36, %37 : vector<8x512xi1>, vector<8x512xf32>
    %39 = vector.extract_strided_slice %29 {offsets = [24, 0], sizes = [8, 512], strides = [1, 1]} : vector<32x512xf32> to vector<8x512xf32>
    %40 = vector.extract_strided_slice %29 {offsets = [0, 0], sizes = [8, 512], strides = [1, 1]} : vector<32x512xf32> to vector<8x512xf32>
    %41 = arith.select %18, %39, %40 : vector<8x512xi1>, vector<8x512xf32>
    %cst_11 = arith.constant 0.000000e+00 : f32
    %42 = vector.broadcast %cst_11 : f32 to vector<8x128xf32>
    %cst_12 = arith.constant 0.000000e+00 : f32
    %43 = vector.broadcast %cst_12 : f32 to vector<8x128xf32>
    %44 = arith.truncf %42 : vector<8x128xf32> to vector<8x128xbf16>
    %cst_13 = arith.constant dense<0.000000e+00> : vector<8x512xf32>
    %45 = tpu.matmul %44, %24, %cst_13 {dimension_numbers = #tpu.dot_dimension_numbers<[1], [0], [0], [1], [0, 0, 1, 1], [], []>} : vector<8x128xbf16>, vector<128x512xbf16>, vector<8x512xf32> -> vector<8x512xf32>
    %46 = arith.addf %32, %45 : vector<8x512xf32>
    %47 = vector.extract_strided_slice %46 {offsets = [0, 0], sizes = [8, 384], strides = [1, 1]} : vector<8x512xf32> to vector<8x384xf32>
    %48 = arith.negf %47 : vector<8x384xf32>
    %49 = math.exp %48 : vector<8x384xf32>
    %cst_14 = arith.constant 1.000000e+00 : f32
    %50 = vector.broadcast %cst_14 : f32 to vector<8x384xf32>
    %51 = arith.addf %50, %49 : vector<8x384xf32>
    %52 = arith.divf %50, %51 : vector<8x384xf32>
    %53 = vector.extract_strided_slice %52 {offsets = [0, 0], sizes = [8, 128], strides = [1, 1]} : vector<8x384xf32> to vector<8x128xf32>
    %54 = vector.extract_strided_slice %52 {offsets = [0, 128], sizes = [8, 128], strides = [1, 1]} : vector<8x384xf32> to vector<8x128xf32>
    %55 = vector.extract_strided_slice %52 {offsets = [0, 256], sizes = [8, 128], strides = [1, 1]} : vector<8x384xf32> to vector<8x128xf32>
    %56 = vector.extract_strided_slice %46 {offsets = [0, 384], sizes = [8, 128], strides = [1, 1]} : vector<8x512xf32> to vector<8x128xf32>
    %57 = math.tanh %56 : vector<8x128xf32>
    %58 = arith.mulf %54, %43 : vector<8x128xf32>
    %59 = arith.mulf %53, %57 : vector<8x128xf32>
    %60 = arith.addf %58, %59 : vector<8x128xf32>
    %61 = math.tanh %60 : vector<8x128xf32>
    %62 = arith.mulf %55, %61 : vector<8x128xf32>
    %63 = arith.truncf %62 : vector<8x128xf32> to vector<8x128xbf16>
    %cst_15 = arith.constant dense<0.000000e+00> : vector<8x512xf32>
    %64 = tpu.matmul %63, %24, %cst_15 {dimension_numbers = #tpu.dot_dimension_numbers<[1], [0], [0], [1], [0, 0, 1, 1], [], []>} : vector<8x128xbf16>, vector<128x512xbf16>, vector<8x512xf32> -> vector<8x512xf32>
    %65 = arith.addf %35, %64 : vector<8x512xf32>
    %66 = vector.extract_strided_slice %65 {offsets = [0, 0], sizes = [8, 384], strides = [1, 1]} : vector<8x512xf32> to vector<8x384xf32>
    %67 = arith.negf %66 : vector<8x384xf32>
    %68 = math.exp %67 : vector<8x384xf32>
    %cst_16 = arith.constant 1.000000e+00 : f32
    %69 = vector.broadcast %cst_16 : f32 to vector<8x384xf32>
    %70 = arith.addf %69, %68 : vector<8x384xf32>
    %71 = arith.divf %69, %70 : vector<8x384xf32>
    %72 = vector.extract_strided_slice %71 {offsets = [0, 0], sizes = [8, 128], strides = [1, 1]} : vector<8x384xf32> to vector<8x128xf32>
    %73 = vector.extract_strided_slice %71 {offsets = [0, 128], sizes = [8, 128], strides = [1, 1]} : vector<8x384xf32> to vector<8x128xf32>
    %74 = vector.extract_strided_slice %71 {offsets = [0, 256], sizes = [8, 128], strides = [1, 1]} : vector<8x384xf32> to vector<8x128xf32>
    %75 = vector.extract_strided_slice %65 {offsets = [0, 384], sizes = [8, 128], strides = [1, 1]} : vector<8x512xf32> to vector<8x128xf32>
    %76 = math.tanh %75 : vector<8x128xf32>
    %77 = arith.mulf %73, %60 : vector<8x128xf32>
    %78 = arith.mulf %72, %76 : vector<8x128xf32>
    %79 = arith.addf %77, %78 : vector<8x128xf32>
    %80 = math.tanh %79 : vector<8x128xf32>
    %81 = arith.mulf %74, %80 : vector<8x128xf32>
    %82 = arith.truncf %81 : vector<8x128xf32> to vector<8x128xbf16>
    %cst_17 = arith.constant dense<0.000000e+00> : vector<8x512xf32>
    %83 = tpu.matmul %82, %24, %cst_17 {dimension_numbers = #tpu.dot_dimension_numbers<[1], [0], [0], [1], [0, 0, 1, 1], [], []>} : vector<8x128xbf16>, vector<128x512xbf16>, vector<8x512xf32> -> vector<8x512xf32>
    %84 = arith.addf %38, %83 : vector<8x512xf32>
    %85 = vector.extract_strided_slice %84 {offsets = [0, 0], sizes = [8, 384], strides = [1, 1]} : vector<8x512xf32> to vector<8x384xf32>
    %86 = arith.negf %85 : vector<8x384xf32>
    %87 = math.exp %86 : vector<8x384xf32>
    %cst_18 = arith.constant 1.000000e+00 : f32
    %88 = vector.broadcast %cst_18 : f32 to vector<8x384xf32>
    %89 = arith.addf %88, %87 : vector<8x384xf32>
    %90 = arith.divf %88, %89 : vector<8x384xf32>
    %91 = vector.extract_strided_slice %90 {offsets = [0, 0], sizes = [8, 128], strides = [1, 1]} : vector<8x384xf32> to vector<8x128xf32>
    %92 = vector.extract_strided_slice %90 {offsets = [0, 128], sizes = [8, 128], strides = [1, 1]} : vector<8x384xf32> to vector<8x128xf32>
    %93 = vector.extract_strided_slice %90 {offsets = [0, 256], sizes = [8, 128], strides = [1, 1]} : vector<8x384xf32> to vector<8x128xf32>
    %94 = vector.extract_strided_slice %84 {offsets = [0, 384], sizes = [8, 128], strides = [1, 1]} : vector<8x512xf32> to vector<8x128xf32>
    %95 = math.tanh %94 : vector<8x128xf32>
    %96 = arith.mulf %92, %79 : vector<8x128xf32>
    %97 = arith.mulf %91, %95 : vector<8x128xf32>
    %98 = arith.addf %96, %97 : vector<8x128xf32>
    %99 = math.tanh %98 : vector<8x128xf32>
    %100 = arith.mulf %93, %99 : vector<8x128xf32>
    %101 = arith.truncf %100 : vector<8x128xf32> to vector<8x128xbf16>
    %cst_19 = arith.constant dense<0.000000e+00> : vector<8x512xf32>
    %102 = tpu.matmul %101, %24, %cst_19 {dimension_numbers = #tpu.dot_dimension_numbers<[1], [0], [0], [1], [0, 0, 1, 1], [], []>} : vector<8x128xbf16>, vector<128x512xbf16>, vector<8x512xf32> -> vector<8x512xf32>
    %103 = arith.addf %41, %102 : vector<8x512xf32>
    %104 = vector.extract_strided_slice %103 {offsets = [0, 0], sizes = [8, 384], strides = [1, 1]} : vector<8x512xf32> to vector<8x384xf32>
    %105 = arith.negf %104 : vector<8x384xf32>
    %106 = math.exp %105 : vector<8x384xf32>
    %cst_20 = arith.constant 1.000000e+00 : f32
    %107 = vector.broadcast %cst_20 : f32 to vector<8x384xf32>
    %108 = arith.addf %107, %106 : vector<8x384xf32>
    %109 = arith.divf %107, %108 : vector<8x384xf32>
    %110 = vector.extract_strided_slice %109 {offsets = [0, 0], sizes = [8, 128], strides = [1, 1]} : vector<8x384xf32> to vector<8x128xf32>
    %111 = vector.extract_strided_slice %109 {offsets = [0, 128], sizes = [8, 128], strides = [1, 1]} : vector<8x384xf32> to vector<8x128xf32>
    %112 = vector.extract_strided_slice %109 {offsets = [0, 256], sizes = [8, 128], strides = [1, 1]} : vector<8x384xf32> to vector<8x128xf32>
    %113 = vector.extract_strided_slice %103 {offsets = [0, 384], sizes = [8, 128], strides = [1, 1]} : vector<8x512xf32> to vector<8x128xf32>
    %114 = math.tanh %113 : vector<8x128xf32>
    %115 = arith.mulf %111, %98 : vector<8x128xf32>
    %116 = arith.mulf %110, %114 : vector<8x128xf32>
    %117 = arith.addf %115, %116 : vector<8x128xf32>
    %118 = math.tanh %117 : vector<8x128xf32>
    %119 = arith.mulf %112, %118 : vector<8x128xf32>
    %120 = arith.select %21, %62, %119 : vector<8x128xi1>, vector<8x128xf32>
    %121 = arith.select %21, %81, %100 : vector<8x128xi1>, vector<8x128xf32>
    %122 = arith.select %21, %100, %81 : vector<8x128xi1>, vector<8x128xf32>
    %123 = arith.select %21, %119, %62 : vector<8x128xi1>, vector<8x128xf32>
    %124 = tpu.concatenate %120, %121, %122, %123 in 0 : vector<8x128xf32>, vector<8x128xf32>, vector<8x128xf32>, vector<8x128xf32> -> vector<32x128xf32>
    %c0_21 = arith.constant 0 : index
    %c0_22 = arith.constant 0 : index
    %125 = vector.load %arg4[%c0_21, %c0_22] : memref<128x512xbf16, #tpu.memory_space<vmem>>, vector<128x512xbf16>
    %c0_23 = arith.constant 0 : index
    %c0_24 = arith.constant 0 : index
    %126 = vector.load %arg5[%c0_23, %c0_24] : memref<128x512xbf16, #tpu.memory_space<vmem>>, vector<128x512xbf16>
    %c0_25 = arith.constant 0 : index
    %c0_26 = arith.constant 0 : index
    %127 = vector.load %arg6[%c0_25, %c0_26] : memref<1x512xf32, #tpu.memory_space<vmem>>, vector<1x512xf32>
    %128 = arith.truncf %124 : vector<32x128xf32> to vector<32x128xbf16>
    %cst_27 = arith.constant dense<0.000000e+00> : vector<32x512xf32>
    %129 = tpu.matmul %128, %125, %cst_27 {dimension_numbers = #tpu.dot_dimension_numbers<[1], [0], [0], [1], [0, 0, 1, 1], [], []>} : vector<32x128xbf16>, vector<128x512xbf16>, vector<32x512xf32> -> vector<32x512xf32>
    %130 = vector.broadcast %127 : vector<1x512xf32> to vector<32x512xf32>
    %131 = arith.addf %129, %130 : vector<32x512xf32>
    %132 = vector.extract_strided_slice %131 {offsets = [0, 0], sizes = [8, 512], strides = [1, 1]} : vector<32x512xf32> to vector<8x512xf32>
    %133 = vector.extract_strided_slice %131 {offsets = [24, 0], sizes = [8, 512], strides = [1, 1]} : vector<32x512xf32> to vector<8x512xf32>
    %134 = arith.select %18, %132, %133 : vector<8x512xi1>, vector<8x512xf32>
    %135 = vector.extract_strided_slice %131 {offsets = [8, 0], sizes = [8, 512], strides = [1, 1]} : vector<32x512xf32> to vector<8x512xf32>
    %136 = vector.extract_strided_slice %131 {offsets = [16, 0], sizes = [8, 512], strides = [1, 1]} : vector<32x512xf32> to vector<8x512xf32>
    %137 = arith.select %18, %135, %136 : vector<8x512xi1>, vector<8x512xf32>
    %138 = vector.extract_strided_slice %131 {offsets = [16, 0], sizes = [8, 512], strides = [1, 1]} : vector<32x512xf32> to vector<8x512xf32>
    %139 = vector.extract_strided_slice %131 {offsets = [8, 0], sizes = [8, 512], strides = [1, 1]} : vector<32x512xf32> to vector<8x512xf32>
    %140 = arith.select %18, %138, %139 : vector<8x512xi1>, vector<8x512xf32>
    %141 = vector.extract_strided_slice %131 {offsets = [24, 0], sizes = [8, 512], strides = [1, 1]} : vector<32x512xf32> to vector<8x512xf32>
    %142 = vector.extract_strided_slice %131 {offsets = [0, 0], sizes = [8, 512], strides = [1, 1]} : vector<32x512xf32> to vector<8x512xf32>
    %143 = arith.select %18, %141, %142 : vector<8x512xi1>, vector<8x512xf32>
    %cst_28 = arith.constant 0.000000e+00 : f32
    %144 = vector.broadcast %cst_28 : f32 to vector<8x128xf32>
    %cst_29 = arith.constant 0.000000e+00 : f32
    %145 = vector.broadcast %cst_29 : f32 to vector<8x128xf32>
    %146 = arith.truncf %144 : vector<8x128xf32> to vector<8x128xbf16>
    %cst_30 = arith.constant dense<0.000000e+00> : vector<8x512xf32>
    %147 = tpu.matmul %146, %126, %cst_30 {dimension_numbers = #tpu.dot_dimension_numbers<[1], [0], [0], [1], [0, 0, 1, 1], [], []>} : vector<8x128xbf16>, vector<128x512xbf16>, vector<8x512xf32> -> vector<8x512xf32>
    %148 = arith.addf %134, %147 : vector<8x512xf32>
    %149 = vector.extract_strided_slice %148 {offsets = [0, 0], sizes = [8, 384], strides = [1, 1]} : vector<8x512xf32> to vector<8x384xf32>
    %150 = arith.negf %149 : vector<8x384xf32>
    %151 = math.exp %150 : vector<8x384xf32>
    %cst_31 = arith.constant 1.000000e+00 : f32
    %152 = vector.broadcast %cst_31 : f32 to vector<8x384xf32>
    %153 = arith.addf %152, %151 : vector<8x384xf32>
    %154 = arith.divf %152, %153 : vector<8x384xf32>
    %155 = vector.extract_strided_slice %154 {offsets = [0, 0], sizes = [8, 128], strides = [1, 1]} : vector<8x384xf32> to vector<8x128xf32>
    %156 = vector.extract_strided_slice %154 {offsets = [0, 128], sizes = [8, 128], strides = [1, 1]} : vector<8x384xf32> to vector<8x128xf32>
    %157 = vector.extract_strided_slice %154 {offsets = [0, 256], sizes = [8, 128], strides = [1, 1]} : vector<8x384xf32> to vector<8x128xf32>
    %158 = vector.extract_strided_slice %148 {offsets = [0, 384], sizes = [8, 128], strides = [1, 1]} : vector<8x512xf32> to vector<8x128xf32>
    %159 = math.tanh %158 : vector<8x128xf32>
    %160 = arith.mulf %156, %145 : vector<8x128xf32>
    %161 = arith.mulf %155, %159 : vector<8x128xf32>
    %162 = arith.addf %160, %161 : vector<8x128xf32>
    %163 = math.tanh %162 : vector<8x128xf32>
    %164 = arith.mulf %157, %163 : vector<8x128xf32>
    %165 = arith.truncf %164 : vector<8x128xf32> to vector<8x128xbf16>
    %cst_32 = arith.constant dense<0.000000e+00> : vector<8x512xf32>
    %166 = tpu.matmul %165, %126, %cst_32 {dimension_numbers = #tpu.dot_dimension_numbers<[1], [0], [0], [1], [0, 0, 1, 1], [], []>} : vector<8x128xbf16>, vector<128x512xbf16>, vector<8x512xf32> -> vector<8x512xf32>
    %167 = arith.addf %137, %166 : vector<8x512xf32>
    %168 = vector.extract_strided_slice %167 {offsets = [0, 0], sizes = [8, 384], strides = [1, 1]} : vector<8x512xf32> to vector<8x384xf32>
    %169 = arith.negf %168 : vector<8x384xf32>
    %170 = math.exp %169 : vector<8x384xf32>
    %cst_33 = arith.constant 1.000000e+00 : f32
    %171 = vector.broadcast %cst_33 : f32 to vector<8x384xf32>
    %172 = arith.addf %171, %170 : vector<8x384xf32>
    %173 = arith.divf %171, %172 : vector<8x384xf32>
    %174 = vector.extract_strided_slice %173 {offsets = [0, 0], sizes = [8, 128], strides = [1, 1]} : vector<8x384xf32> to vector<8x128xf32>
    %175 = vector.extract_strided_slice %173 {offsets = [0, 128], sizes = [8, 128], strides = [1, 1]} : vector<8x384xf32> to vector<8x128xf32>
    %176 = vector.extract_strided_slice %173 {offsets = [0, 256], sizes = [8, 128], strides = [1, 1]} : vector<8x384xf32> to vector<8x128xf32>
    %177 = vector.extract_strided_slice %167 {offsets = [0, 384], sizes = [8, 128], strides = [1, 1]} : vector<8x512xf32> to vector<8x128xf32>
    %178 = math.tanh %177 : vector<8x128xf32>
    %179 = arith.mulf %175, %162 : vector<8x128xf32>
    %180 = arith.mulf %174, %178 : vector<8x128xf32>
    %181 = arith.addf %179, %180 : vector<8x128xf32>
    %182 = math.tanh %181 : vector<8x128xf32>
    %183 = arith.mulf %176, %182 : vector<8x128xf32>
    %184 = arith.truncf %183 : vector<8x128xf32> to vector<8x128xbf16>
    %cst_34 = arith.constant dense<0.000000e+00> : vector<8x512xf32>
    %185 = tpu.matmul %184, %126, %cst_34 {dimension_numbers = #tpu.dot_dimension_numbers<[1], [0], [0], [1], [0, 0, 1, 1], [], []>} : vector<8x128xbf16>, vector<128x512xbf16>, vector<8x512xf32> -> vector<8x512xf32>
    %186 = arith.addf %140, %185 : vector<8x512xf32>
    %187 = vector.extract_strided_slice %186 {offsets = [0, 0], sizes = [8, 384], strides = [1, 1]} : vector<8x512xf32> to vector<8x384xf32>
    %188 = arith.negf %187 : vector<8x384xf32>
    %189 = math.exp %188 : vector<8x384xf32>
    %cst_35 = arith.constant 1.000000e+00 : f32
    %190 = vector.broadcast %cst_35 : f32 to vector<8x384xf32>
    %191 = arith.addf %190, %189 : vector<8x384xf32>
    %192 = arith.divf %190, %191 : vector<8x384xf32>
    %193 = vector.extract_strided_slice %192 {offsets = [0, 0], sizes = [8, 128], strides = [1, 1]} : vector<8x384xf32> to vector<8x128xf32>
    %194 = vector.extract_strided_slice %192 {offsets = [0, 128], sizes = [8, 128], strides = [1, 1]} : vector<8x384xf32> to vector<8x128xf32>
    %195 = vector.extract_strided_slice %192 {offsets = [0, 256], sizes = [8, 128], strides = [1, 1]} : vector<8x384xf32> to vector<8x128xf32>
    %196 = vector.extract_strided_slice %186 {offsets = [0, 384], sizes = [8, 128], strides = [1, 1]} : vector<8x512xf32> to vector<8x128xf32>
    %197 = math.tanh %196 : vector<8x128xf32>
    %198 = arith.mulf %194, %181 : vector<8x128xf32>
    %199 = arith.mulf %193, %197 : vector<8x128xf32>
    %200 = arith.addf %198, %199 : vector<8x128xf32>
    %201 = math.tanh %200 : vector<8x128xf32>
    %202 = arith.mulf %195, %201 : vector<8x128xf32>
    %203 = arith.truncf %202 : vector<8x128xf32> to vector<8x128xbf16>
    %cst_36 = arith.constant dense<0.000000e+00> : vector<8x512xf32>
    %204 = tpu.matmul %203, %126, %cst_36 {dimension_numbers = #tpu.dot_dimension_numbers<[1], [0], [0], [1], [0, 0, 1, 1], [], []>} : vector<8x128xbf16>, vector<128x512xbf16>, vector<8x512xf32> -> vector<8x512xf32>
    %205 = arith.addf %143, %204 : vector<8x512xf32>
    %206 = vector.extract_strided_slice %205 {offsets = [0, 0], sizes = [8, 384], strides = [1, 1]} : vector<8x512xf32> to vector<8x384xf32>
    %207 = arith.negf %206 : vector<8x384xf32>
    %208 = math.exp %207 : vector<8x384xf32>
    %cst_37 = arith.constant 1.000000e+00 : f32
    %209 = vector.broadcast %cst_37 : f32 to vector<8x384xf32>
    %210 = arith.addf %209, %208 : vector<8x384xf32>
    %211 = arith.divf %209, %210 : vector<8x384xf32>
    %212 = vector.extract_strided_slice %211 {offsets = [0, 0], sizes = [8, 128], strides = [1, 1]} : vector<8x384xf32> to vector<8x128xf32>
    %213 = vector.extract_strided_slice %211 {offsets = [0, 128], sizes = [8, 128], strides = [1, 1]} : vector<8x384xf32> to vector<8x128xf32>
    %214 = vector.extract_strided_slice %211 {offsets = [0, 256], sizes = [8, 128], strides = [1, 1]} : vector<8x384xf32> to vector<8x128xf32>
    %215 = vector.extract_strided_slice %205 {offsets = [0, 384], sizes = [8, 128], strides = [1, 1]} : vector<8x512xf32> to vector<8x128xf32>
    %216 = math.tanh %215 : vector<8x128xf32>
    %217 = arith.mulf %213, %200 : vector<8x128xf32>
    %218 = arith.mulf %212, %216 : vector<8x128xf32>
    %219 = arith.addf %217, %218 : vector<8x128xf32>
    %220 = math.tanh %219 : vector<8x128xf32>
    %221 = arith.mulf %214, %220 : vector<8x128xf32>
    %222 = arith.select %21, %221, %164 : vector<8x128xi1>, vector<8x128xf32>
    %c0_38 = arith.constant 0 : index
    %c0_39 = arith.constant 0 : index
    %223 = vector.load %arg7[%c0_38, %c0_39] : memref<8x128xf32, #tpu.memory_space<vmem>>, vector<8x128xf32>
    tpu.vector_store %arg7[%c0_38, %c0_39], %222 {strides = array<i32>} : memref<8x128xf32, #tpu.memory_space<vmem>>, vector<8x128xf32>,
    return
  }
}

</mosaic_0001>

<bundles_post_ra>
// kernel: lstm_feature_extractor_forward.1
= control target key start
LH: loop header
LB: loop body
LE: loop exit
PB: predicated region body
PF: predicated region fallthrough
CT: control target
= control target key end

     0   :  { %12 = vsyncpa [#allocation3], 0  ;;  %s3268_s0 = inlined_call_operand.vmem [shape: f32[32,16], index: 0, kind: input, shape index: {}]   ;;  %s3269_s1 = inlined_call_operand.vmem [shape: bf16[16,512], index: 1, kind: input, shape index: {}]   ;;  %s3270_s2 = inlined_call_operand.hbm [shape: bf16[128,512], index: 2, kind: input, shape index: {}]   ;;  %s3271_s3 = inlined_call_operand.vmem [shape: f32[1,512], index: 3, kind: input, shape index: {}]   ;;  %s3272_s4 = inlined_call_operand.hbm [shape: bf16[128,512], index: 4, kind: input, shape index: {}]   ;;  %s3273_s5 = inlined_call_operand.hbm [shape: bf16[128,512], index: 5, kind: input, shape index: {}]   ;;  %s3274_s6 = inlined_call_operand.vmem [shape: f32[1,512], index: 6, kind: input, shape index: {}]   ;;  %s3275_s7 = inlined_call_operand.vmem [shape: f32[8,128], index: 7, kind: output, shape index: {}]  }
   0x1   :  { %13 = vsyncpa [#allocation5], 0  ;;  %s2403_s24 = smov [#allocation4]   ;;  %s2404_s26 = smov [#allocation2]  }
   0x2   :  { %s37_s25 = sshll.u32 %s2403_s24, 4  ;;  %s23_s27 = sshll.u32 %s2404_s26, 4  ;;  %s38_s25 = int_to_ptr.vmem [resolvable:$true] %s37_s25  ;;  %s24_s27 = int_to_ptr.vmem [resolvable:$true] %s23_s27 }
   0x3   :  { %s2347_s28 = scalar_lea.vmem %s38_s25, 4096  ;;  %p2352_p1 = scmp.lt.s32.totalorder %s38_s25, %s38_s25 }
   0x4   :  { %p2348_p0 = scmp.ne.s32.totalorder %s38_s25, %s2347_s28  ;;  %p2353_p2 = scmp.lt.s32.totalorder %s2347_s28, %s2347_s28 }
   0x6   :  { %p2354_p3 = por %p2353_p2, %p2352_p1 }
   0x8   :  { %p2355_p4 = pnand %p2354_p3, %p2348_p0 }
   0xa   :  { %2358 = shalt.err (!%p2355_p4)
}
   0xb   :  { %s2405_s29 = smov 256   ;;  %s2406_s30 = smov 16  }
   0xc   :  { %43 = dma.hbm_to_vmem [thread:$0]  %s3272_s4, 4096, %s38_s25, [#allocation5], %s2405_s29, %s2405_s29, %s2406_s30  }
   0xd   :  { %s2367_s10 = scalar_lea.vmem %s24_s27, 4096  ;;  %p2372_p6 = scmp.lt.s32.totalorder %s24_s27, %s24_s27 }
   0xe   :  { %p2368_p5 = scmp.ne.s32.totalorder %s24_s27, %s2367_s10  ;;  %p2373_p7 = scmp.lt.s32.totalorder %s2367_s10, %s2367_s10 }
  0x10   :  { %p2374_p8 = por %p2373_p7, %p2372_p6 }
  0x12   :  { %p2375_p9 = pnand %p2374_p8, %p2368_p5 }
  0x14   :  { %2378 = shalt.err (!%p2375_p9)
}
  0x15   :  { %29 = dma.hbm_to_vmem [thread:$0]  %s3270_s2, 4096, %s24_s27, [#allocation3], %s2405_s29, %s2405_s29, %s2406_s30  }
  0x16   :  { %s2407_s13 = smov [#allocation6]  }
  0x17   :  { %s49_s14 = sshll.u32 %s2407_s13, 4  ;;  %s50_s14 = int_to_ptr.vmem [resolvable:$true] %s49_s14 }
  0x18   :  { %s2387_s15 = scalar_lea.vmem %s50_s14, 4096  ;;  %p2392_p11 = scmp.lt.s32.totalorder %s50_s14, %s50_s14 }
  0x19   :  { %p2388_p10 = scmp.ne.s32.totalorder %s50_s14, %s2387_s15  ;;  %p2393_p12 = scmp.lt.s32.totalorder %s2387_s15, %s2387_s15 }
  0x1b   :  { %p2394_p13 = por %p2393_p12, %p2392_p11 }
  0x1d   :  { %p2395_p0 = pnand %p2394_p13, %p2388_p10 }
  0x1f   :  { %2398 = shalt.err (!%p2395_p0)
}
  0x20   :  { %55 = dma.hbm_to_vmem [thread:$0]  %s3273_s5, 4096, %s50_s14, [#allocation5], %s2405_s29, %s2405_s29, %s2406_s30  }
  0x21   :  { %2399 = dma.done.wait [#allocation3], 4096  }
  0x22   :  { %2400 = vsyncadd [#allocation3], 4294963200 }
  0x23   :  { %2401 = dma.done.wait [#allocation5], 8192  }
  0x24   :  { %2402 = vsyncadd [#allocation5], 4294959104  ;;  %v3280_v0 = vmov 0   ;;  %v2061_v1 = vld [vmem:[%s3269_s1 + $0x4] ss:$16 sps:$4 sm:$0xff]   ;;  %v127_v6 = vld [vmem:[%s3268_s0 + $0x8] sm:$0xff]  ;;  %v68_v43 = vlaneseq }
  0x25   :  { %249 = vmatprep.mubr.bf16.mxu0 %v3280_v0  ;;  %302 = vmatprep.mubr.bf16.mxu1 %v3280_v0  ;;  %v2063_v2 = vld [vmem:[%s3269_s1 + $0xc] ss:$16 sps:$4 sm:$0xff]   ;;  %v2065_v3 = vld [vmem:[%s3269_s1] ss:$16 sps:$4 sm:$0xff]   ;;  %v2066_v4 = vld [vmem:[%s3269_s1 + $0x8] ss:$16 sps:$4 sm:$0xff]  }
  0x26   :  { %231 = vmatprep.subr.bf16.mxu0 %v2061_v1  ;;  %v126_v5 = vld [vmem:[%s3268_s0] sm:$0xff]  ;;  %284 = vmatprep.subr.bf16.mxu1 %v2063_v2  ;;  %vm210_vm0 = vcmask 130048   ;;  %v2480_v9 = vld [vmem:[#allocation2 + $0xec] ss:$16 sps:$4 sm:$0xff]   ;;  %v2484_v11 = vld [vmem:[#allocation2 + $0xe8] ss:$16 sps:$4 sm:$0xff]  }
  0x27   :  { %232 = vmatpush1.bf16.msra.mxu0 %v2065_v3  ;;  %285 = vmatpush1.bf16.msra.mxu1 %v2066_v4  ;;  %v167_v7 = vpack.c.bf16 %v127_v6, %v126_v5  ;;  %v2478_v8 = vld [vmem:[#allocation2 + $0xe4] ss:$16 sps:$4 sm:$0xff]   ;;  %v2482_v10 = vld [vmem:[#allocation2 + $0xe0] ss:$16 sps:$4 sm:$0xff]   ;;  %v2491_v13 = vld [vmem:[#allocation2 + $0xcc] ss:$16 sps:$4 sm:$0xff]  }
  0x28   :  { %499 = vmatprep.subr.bf16.mxu0 %v2478_v8  ;;  %v2487_v12 = vld [vmem:[#allocation2 + $0xc4] ss:$16 sps:$4 sm:$0xff]   ;;  %540 = vmatprep.subr.bf16.mxu1 %v2480_v9  ;;  %v2495_v14 = vld [vmem:[#allocation2 + $0xc0] ss:$16 sps:$4 sm:$0xff]   ;;  %v2497_v15 = vld [vmem:[#allocation2 + $0xc8] ss:$16 sps:$4 sm:$0xff]  }
  0x29   :  { %v128_v16 = vld [vmem:[%s3268_s0 + $0x10] sm:$0xff]  ;;  %v129_v17 = vld [vmem:[%s3268_s0 + $0x18] sm:$0xff]  ;;  %v2626_v44 = vshrl.u32 %v68_v43, 7  ;;  %v2628_v45 = vand.u32 127, %v68_v43  ;;  %v166_v48 = vld [vmem:[%s3271_s3] sm:$0xf] }
  0x2a   :  { %1931 = vmatmul.mubr.msk.bf16.vlgmr.msra.gmra.mxu0 %vm210_vm0, %v167_v7  ;;  %1933 = vmatmul.mubr.msk.bf16.vlgmr.msra.gmra.mxu1 %vm210_vm0, %v167_v7  ;;  %v2509_v18 = vld [vmem:[#allocation2 + $0xa4] ss:$16 sps:$4 sm:$0xff]   ;;  %v168_v19 = vpack.c.bf16 %v129_v17, %v128_v16  ;;  %v2511_v20 = vld [vmem:[#allocation2 + $0xac] ss:$16 sps:$4 sm:$0xff]   ;;  %v2513_v21 = vld [vmem:[#allocation2 + $0xa0] ss:$16 sps:$4 sm:$0xff]  }
  0x2b   :  { %500 = vmatpush1.bf16.msra.mxu0 %v2482_v10  ;;  %541 = vmatpush1.bf16.msra.mxu1 %v2484_v11  ;;  %v2517_v22 = vld [vmem:[#allocation2 + $0xa8] ss:$16 sps:$4 sm:$0xff]   ;;  %v2521_v23 = vld [vmem:[#allocation2 + $0x84] ss:$16 sps:$4 sm:$0xff]   ;;  %v2524_v24 = vld [vmem:[#allocation2 + $0x8c] ss:$16 sps:$4 sm:$0xff]  }
  0x2c   :  { %501 = vmatprep.subr.bf16.mxu0 %v2487_v12  ;;  %542 = vmatprep.subr.bf16.mxu1 %v2491_v13  ;;  %v2529_v25 = vld [vmem:[#allocation2 + $0x80] ss:$16 sps:$4 sm:$0xff]   ;;  %v2531_v26 = vld [vmem:[#allocation2 + $0x88] ss:$16 sps:$4 sm:$0xff]   ;;  %v2535_v27 = vld [vmem:[#allocation2 + $0x64] ss:$16 sps:$4 sm:$0xff]  }
  0x2d   :  { %259 = vmatprep.mubr.bf16.mxu0 %v3280_v0  ;;  %312 = vmatprep.mubr.bf16.mxu1 %v3280_v0  ;;  %v2538_v28 = vld [vmem:[#allocation2 + $0x6c] ss:$16 sps:$4 sm:$0xff]   ;;  %v2541_v29 = vld [vmem:[#allocation2 + $0x60] ss:$16 sps:$4 sm:$0xff]   ;;  %v2545_v30 = vld [vmem:[#allocation2 + $0x68] ss:$16 sps:$4 sm:$0xff]  }
  0x2e   :  { %v2549_v31 = vld [vmem:[#allocation2 + $0x44] ss:$16 sps:$4 sm:$0xff]   ;;  %v2552_v32 = vld [vmem:[#allocation2 + $0x4c] ss:$16 sps:$4 sm:$0xff]   ;;  %v2555_v33 = vld [vmem:[#allocation2 + $0x40] ss:$16 sps:$4 sm:$0xff]  }
  0x2f   :  { %502 = vmatpush1.bf16.msra.mxu0 %v2495_v14  ;;  %543 = vmatpush1.bf16.msra.mxu1 %v2497_v15  ;;  %v2557_v34 = vld [vmem:[#allocation2 + $0x48] ss:$16 sps:$4 sm:$0xff]   ;;  %v2561_v35 = vld [vmem:[#allocation2 + $0x24] ss:$16 sps:$4 sm:$0xff]   ;;  %v2563_v36 = vld [vmem:[#allocation2 + $0x2c] ss:$16 sps:$4 sm:$0xff]  }
  0x30   :  { %503 = vmatprep.subr.bf16.mxu0 %v2509_v18  ;;  %544 = vmatprep.subr.bf16.mxu1 %v2511_v20  ;;  %v2566_v37 = vld [vmem:[#allocation2 + $0x20] ss:$16 sps:$4 sm:$0xff]   ;;  %v2568_v38 = vld [vmem:[#allocation2 + $0x28] ss:$16 sps:$4 sm:$0xff]   ;;  %v2570_v39 = vld [vmem:[#allocation2 + $0x4] ss:$16 sps:$4 sm:$0xff]  }
  0x31   :  { %v2573_v40 = vld [vmem:[#allocation2 + $0xc] ss:$16 sps:$4 sm:$0xff]   ;;  %v2578_v41 = vld [vmem:[#allocation2] ss:$16 sps:$4 sm:$0xff]   ;;  %v2580_v42 = vld [vmem:[#allocation2 + $0x8] ss:$16 sps:$4 sm:$0xff]  }
  0x32   :  { %1932 = vmatmul.mubr.msk.bf16.gmra.mxu0 %vm210_vm0, %v168_v19  ;;  %1934 = vmatmul.mubr.msk.bf16.gmra.mxu1 %vm210_vm0, %v168_v19  ;;  %3291 = vst [vmem:[#allocation9_spill] sm:$0xff] %v2626_v44  ;;  %3292 = vst [vmem:[#allocation10_spill] sm:$0xff] %v2628_v45  ;;  %v3278_v46 = vsub.s32 2, %v2626_v44  ;;  %v3279_v47 = vsub.s32 0, %v2626_v44  ;;  %v3276_v50 = vsub.s32 3, %v2626_v44  ;;  %v3277_v51 = vsub.s32 1, %v2626_v44 }
  0x33   :  { %504 = vmatpush1.bf16.msra.mxu0 %v2513_v21  ;;  %545 = vmatpush1.bf16.msra.mxu1 %v2517_v22  ;;  %v71_v53 = vadd.s32 256, %v2628_v45  ;;  %v70_v56 = vadd.s32 128, %v2628_v45  ;;  %v72_v59 = vadd.s32 384, %v2628_v45  ;;  %vm121_vm1 = vcmp.lt.s32.totalorder %v2628_v45, 32 }
  0x34   :  { %505 = vmatprep.subr.bf16.mxu0 %v2521_v23  ;;  %546 = vmatprep.subr.bf16.mxu1 %v2524_v24  ;;  %v181_v55 = vrot.slane %v166_v48, %v3278_v46  ;;  %v173_v57 = vrot.slane %v166_v48, %v3279_v47  ;;  %v185_v61 = vrot.slane %v166_v48, %v3276_v50 }
  0x35   :  { %531 = vmatprep.mubr.bf16.mxu0 %v3280_v0  ;;  %572 = vmatprep.mubr.bf16.mxu1 %v3280_v0  ;;  %v177_v62 = vrot.slane %v166_v48, %v3277_v51  ;;  %v91_v2 = vand.u32 127, %v71_v53  ;;  %v84_v5 = vand.u32 127, %v70_v56  ;;  %v98_v16 = vand.u32 127, %v72_v59 }
  0x37   :  { %506 = vmatpush1.bf16.msra.mxu0 %v2529_v25  ;;  %547 = vmatpush1.bf16.msra.mxu1 %v2531_v26  ;;  %vm2655_vm2 = vcmp.lt.s32.totalorder %v91_v2, 32  ;;  %vm2661_vm3 = vcmp.lt.s32.totalorder %v84_v5, 32  ;;  %vm2667_vm4 = vcmp.lt.s32.totalorder %v98_v16, 32 }
  0x38   :  { %507 = vmatprep.subr.bf16.mxu0 %v2535_v27  ;;  %548 = vmatprep.subr.bf16.mxu1 %v2538_v28 }
  0x3b   :  { %508 = vmatpush1.bf16.msra.mxu0 %v2541_v29  ;;  %549 = vmatpush1.bf16.msra.mxu1 %v2545_v30 }
  0x3c   :  { %509 = vmatprep.subr.bf16.mxu0 %v2549_v31  ;;  %550 = vmatprep.subr.bf16.mxu1 %v2552_v32 }
  0x3f   :  { %510 = vmatpush1.bf16.msra.mxu0 %v2555_v33  ;;  %551 = vmatpush1.bf16.msra.mxu1 %v2557_v34 }
  0x40   :  { %511 = vmatprep.subr.bf16.mxu0 %v2561_v35  ;;  %552 = vmatprep.subr.bf16.mxu1 %v2563_v36 }
  0x43   :  { %512 = vmatpush1.bf16.msra.mxu0 %v2566_v37  ;;  %553 = vmatpush1.bf16.msra.mxu1 %v2568_v38 }
  0x44   :  { %513 = vmatprep.subr.bf16.mxu0 %v2570_v39  ;;  %554 = vmatprep.subr.bf16.mxu1 %v2573_v40 }
  0x47   :  { %514 = vmatpush1.bf16.msra.mxu0 %v2578_v41  ;;  %555 = vmatpush1.bf16.msra.mxu1 %v2580_v42 }
  0x48   :  { %610 = vmatprep.subr.bf16.mxu0 %v2478_v8  ;;  %651 = vmatprep.subr.bf16.mxu1 %v2480_v9 }
  0x4a   :  { %532 = vmatmul.mubr.bf16.vlgmr.msra.gmra.mxu0 %v3280_v0  ;;  %573 = vmatmul.mubr.bf16.vlgmr.msra.gmra.mxu1 %v3280_v0 }
  0x4b   :  { %611 = vmatpush1.bf16.msra.mxu0 %v2482_v10  ;;  %652 = vmatpush1.bf16.msra.mxu1 %v2484_v11 }
  0x4c   :  { %612 = vmatprep.subr.bf16.mxu0 %v2487_v12  ;;  %653 = vmatprep.subr.bf16.mxu1 %v2491_v13 }
  0x4d   :  { %642 = vmatprep.mubr.bf16.mxu0 %v3280_v0  ;;  %683 = vmatprep.mubr.bf16.mxu1 %v3280_v0 }
  0x4f   :  { %613 = vmatpush1.bf16.msra.mxu0 %v2495_v14  ;;  %654 = vmatpush1.bf16.msra.mxu1 %v2497_v15 }
  0x50   :  { %614 = vmatprep.subr.bf16.mxu0 %v2509_v18  ;;  %655 = vmatprep.subr.bf16.mxu1 %v2511_v20 }
  0x53   :  { %615 = vmatpush1.bf16.msra.mxu0 %v2513_v21  ;;  %656 = vmatpush1.bf16.msra.mxu1 %v2517_v22 }
  0x54   :  { %616 = vmatprep.subr.bf16.mxu0 %v2521_v23  ;;  %657 = vmatprep.subr.bf16.mxu1 %v2524_v24 }
  0x57   :  { %617 = vmatpush1.bf16.msra.mxu0 %v2529_v25  ;;  %658 = vmatpush1.bf16.msra.mxu1 %v2531_v26 }
  0x58   :  { %618 = vmatprep.subr.bf16.mxu0 %v2535_v27  ;;  %659 = vmatprep.subr.bf16.mxu1 %v2538_v28 }
  0x5b   :  { %619 = vmatpush1.bf16.msra.mxu0 %v2541_v29  ;;  %660 = vmatpush1.bf16.msra.mxu1 %v2545_v30 }
  0x5c   :  { %620 = vmatprep.subr.bf16.mxu0 %v2549_v31  ;;  %661 = vmatprep.subr.bf16.mxu1 %v2552_v32 }
  0x5f   :  { %621 = vmatpush1.bf16.msra.mxu0 %v2555_v33  ;;  %662 = vmatpush1.bf16.msra.mxu1 %v2557_v34 }
  0x60   :  { %622 = vmatprep.subr.bf16.mxu0 %v2561_v35  ;;  %663 = vmatprep.subr.bf16.mxu1 %v2563_v36 }
  0x63   :  { %623 = vmatpush1.bf16.msra.mxu0 %v2566_v37  ;;  %664 = vmatpush1.bf16.msra.mxu1 %v2568_v38 }
  0x64   :  { %624 = vmatprep.subr.bf16.mxu0 %v2570_v39  ;;  %665 = vmatprep.subr.bf16.mxu1 %v2573_v40 }
  0x67   :  { %625 = vmatpush1.bf16.msra.mxu0 %v2578_v41  ;;  %666 = vmatpush1.bf16.msra.mxu1 %v2580_v42 }
  0x68   :  { %721 = vmatprep.subr.bf16.mxu0 %v2478_v8  ;;  %762 = vmatprep.subr.bf16.mxu1 %v2480_v9 }
  0xea   :  { %v251_v49 = vpop.f32.mrf.mxu0  ;;  %v304_v52 = vpop.f32.mrf.mxu1 }
  0xeb   :  { %v252_v51 = vadd.f32 %v251_v49, %v173_v57 }
  0xec   :  { %v253_v54 = vpop.f32.mrf.mxu0  ;;  %v306_v58 = vpop.f32.mrf.mxu1 }
  0xee   :  { %v255_v60 = vpop.f32.mrf.mxu0  ;;  %v308_v1 = vpop.f32.mrf.mxu1 }
  0xef   :  { %v256_v63 = vadd.f32 %v255_v60, %v173_v57  ;;  %v2648_v4 = vadd.f32 %v308_v1, %v181_v55 }
  0xf0   :  { %v257_v3 = vpop.f32.mrf.mxu0  ;;  %v310_v7 = vpop.f32.mrf.mxu1 }
  0xf1   :  { %v2650_v6 = vadd.f32 %v257_v3, %v177_v62  ;;  %v2653_v19 = vadd.f32 %v310_v7, %v185_v61 }
  0xf2   :  { %v261_v17 = vpop.f32.mrf.mxu0  ;;  %v314_v50 = vpop.f32.mrf.mxu1 }
  0xf3   :  { %v262_v43 = vadd.f32 %v261_v17, %v173_v57  ;;  %v2659_v60 = vadd.f32 %v314_v50, %v181_v55  ;;  %v2679_v50 = vadd.f32 %v304_v52, %v181_v55 }
  0xf4   :  { %v263_v53 = vpop.f32.mrf.mxu0  ;;  %v316_v59 = vpop.f32.mrf.mxu1 }
  0xf5   :  { %v2665_v1 = vadd.f32 %v263_v53, %v177_v62  ;;  %v2673_v2 = vsel %vm121_vm1, %v256_v63, %v262_v43  ;;  %v2677_v7 = vsel %vm121_vm1, %v262_v43, %v256_v63  ;;  %v2681_v17 = vadd.f32 %v316_v59, %v185_v61 }
  0xf6   :  { %3299 = vst [vmem:[#allocation11_spill] sm:$0xff] %v2677_v7  ;;  %v265_v5 = vpop.f32.mrf.mxu0  ;;  %v318_v47 = vpop.f32.mrf.mxu1  ;;  %v2699_v43 = vadd.f32 %v306_v58, %v185_v61 }
  0xf7   :  { %v266_v46 = vadd.f32 %v265_v5, %v173_v57  ;;  %v2701_v16 = vadd.f32 %v318_v47, %v181_v55  ;;  %v2711_v5 = vadd.f32 %v253_v54, %v177_v62 }
  0xf8   :  { %v267_v59 = vpop.f32.mrf.mxu0  ;;  %v320_v63 = vpop.f32.mrf.mxu1 }
  0xf9   :  { %v2713_v53 = vadd.f32 %v267_v59, %v177_v62  ;;  %v2717_v58 = vsel %vm121_vm1, %v266_v46, %v252_v51  ;;  %v2719_v47 = vadd.f32 %v320_v63, %v185_v61  ;;  %v323_v59 = vsel %vm121_vm1, %v252_v51, %v266_v46 }
  0xfa   :  { %3300 = vst [vmem:[#allocation12_spill] sm:$0xff] %v2717_v58  ;;  %v325_v46 = vsel %vm2655_vm2, %v2679_v50, %v2701_v16 }
  0xfb   :  { %v324_v55 = vsel %vm2661_vm3, %v2711_v5, %v2713_v53 }
 0x10a   :  { %v533_v61 = vpop.f32.mrf.mxu0  ;;  %v574_v57 = vpop.f32.mrf.mxu1 }
 0x10b   :  { %v581_v63 = vadd.f32 %v533_v61, %v323_v59  ;;  %v583_v51 = vadd.f32 %v574_v57, %v325_v46 }
 0x10c   :  { %v535_v49 = vpop.f32.mrf.mxu0  ;;  %v576_v54 = vpop.f32.mrf.mxu1 }
 0x10d   :  { %v1967_v52 = vmul.f32 -1.442695, %v581_v63  ;;  %v582_v0 = vadd.f32 %v535_v49, %v324_v55  ;;  %v1969_v59 = vmul.f32 -1.442695, %v583_v51  ;;  %v326_v49 = vsel %vm2667_vm4, %v2699_v43, %v2719_v47 }
 0x10e   :  { %v537_v44 = vpop.f32.mrf.mxu0  ;;  %v578_v7 = vpop.f32.mrf.mxu1 }
 0x10f   :  { %2211 = vpow2.f32 %v1967_v52  ;;  %v1968_v58 = vmul.f32 -1.442695, %v582_v0  ;;  %v584_v44 = vadd.f32 %v576_v54, %v326_v49 }
 0x110   :  { %v538_v62 = vpop.f32.mrf.mxu0  ;;  %v579_v45 = vpop.f32.mrf.mxu1 }
 0x111   :  { %2213 = vpow2.f32 %v1968_v58 }
 0x112   :  { %2215 = vpow2.f32 %v1969_v59 }
 0x11c   :  { %v2212_v55 = vpop.eup %2211 }
 0x11d   :  { %v594_v52 = vadd.f32 1.0, %v2212_v55 }
 0x11e   :  { %v2214_v0 = vpop.eup %2213 }
 0x11f   :  { %2217 = vrcp.f32 %v594_v52  ;;  %v595_v7 = vadd.f32 1.0, %v2214_v0  ;;  %v2216_v45 = vpop.eup %2215 }
 0x120   :  { %2219 = vtanh.f32 %v584_v44  ;;  %v596_v57 = vadd.f32 1.0, %v2216_v45  ;;  %v3301_v44 = vmov 0  }
 0x121   :  { %2221 = vrcp.f32 %v595_v7 }
 0x122   :  { %2223 = vrcp.f32 %v596_v57 }
 0x12c   :  { %v2218_v58 = vpop.eup %2217 }
 0x12d   :  { %v2220_v62 = vpop.eup %2219 }
 0x12e   :  { %v2222_v61 = vpop.eup %2221  ;;  %v605_v46 = vmul.f32 %v2220_v62, %v2218_v58 }
 0x12f   :  { %v604_v63 = vmul.f32 0.0, %v2222_v61  ;;  %v2224_v54 = vpop.eup %2223  ;;  %v3302_v61 = vsel %vm2661_vm3, %v2650_v6, %v2665_v1 }
 0x131   :  { %v2747_v51 = vadd.f32 %v605_v46, %v604_v63 }
 0x133   :  { %2225 = vtanh.f32 %v2747_v51 }
 0x140   :  { %v2226_v49 = vpop.eup %2225 }
 0x141   :  { %v2750_v55 = vmul.f32 %v2226_v49, %v2224_v54 }
 0x143   :  { %v609_v59 = vpack.c.bf16 %v2750_v55, %v2750_v55 }
 0x145   :  { %643 = vmatmul.mubr.bf16.vlgmr.msra.gmra.mxu0 %v609_v59  ;;  %684 = vmatmul.mubr.bf16.vlgmr.msra.gmra.mxu1 %v609_v59 }
 0x146   :  { %722 = vmatpush1.bf16.msra.mxu0 %v2482_v10  ;;  %763 = vmatpush1.bf16.msra.mxu1 %v2484_v11 }
 0x147   :  { %723 = vmatprep.subr.bf16.mxu0 %v2487_v12  ;;  %764 = vmatprep.subr.bf16.mxu1 %v2491_v13 }
 0x148   :  { %753 = vmatprep.mubr.bf16.mxu0 %v3301_v44  ;;  %794 = vmatprep.mubr.bf16.mxu1 %v3301_v44 }
 0x14a   :  { %724 = vmatpush1.bf16.msra.mxu0 %v2495_v14  ;;  %765 = vmatpush1.bf16.msra.mxu1 %v2497_v15 }
 0x14b   :  { %725 = vmatprep.subr.bf16.mxu0 %v2509_v18  ;;  %766 = vmatprep.subr.bf16.mxu1 %v2511_v20 }
 0x14e   :  { %726 = vmatpush1.bf16.msra.mxu0 %v2513_v21  ;;  %767 = vmatpush1.bf16.msra.mxu1 %v2517_v22 }
 0x14f   :  { %727 = vmatprep.subr.bf16.mxu0 %v2521_v23  ;;  %768 = vmatprep.subr.bf16.mxu1 %v2524_v24 }
 0x152   :  { %728 = vmatpush1.bf16.msra.mxu0 %v2529_v25  ;;  %769 = vmatpush1.bf16.msra.mxu1 %v2531_v26 }
 0x153   :  { %729 = vmatprep.subr.bf16.mxu0 %v2535_v27  ;;  %770 = vmatprep.subr.bf16.mxu1 %v2538_v28 }
 0x156   :  { %730 = vmatpush1.bf16.msra.mxu0 %v2541_v29  ;;  %771 = vmatpush1.bf16.msra.mxu1 %v2545_v30 }
 0x157   :  { %731 = vmatprep.subr.bf16.mxu0 %v2549_v31  ;;  %772 = vmatprep.subr.bf16.mxu1 %v2552_v32 }
 0x15a   :  { %732 = vmatpush1.bf16.msra.mxu0 %v2555_v33  ;;  %773 = vmatpush1.bf16.msra.mxu1 %v2557_v34 }
 0x15b   :  { %733 = vmatprep.subr.bf16.mxu0 %v2561_v35  ;;  %774 = vmatprep.subr.bf16.mxu1 %v2563_v36 }
 0x15e   :  { %734 = vmatpush1.bf16.msra.mxu0 %v2566_v37  ;;  %775 = vmatpush1.bf16.msra.mxu1 %v2568_v38 }
 0x15f   :  { %735 = vmatprep.subr.bf16.mxu0 %v2570_v39  ;;  %776 = vmatprep.subr.bf16.mxu1 %v2573_v40 }
 0x162   :  { %736 = vmatpush1.bf16.msra.mxu0 %v2578_v41  ;;  %777 = vmatpush1.bf16.msra.mxu1 %v2580_v42 }
 0x163   :  { %832 = vmatprep.subr.bf16.mxu0 %v2478_v8  ;;  %873 = vmatprep.subr.bf16.mxu1 %v2480_v9  ;;  %v3303_v9 = vsel %vm2655_vm2, %v2648_v4, %v2659_v60 }
 0x205   :  { %v644_v52 = vpop.f32.mrf.mxu0  ;;  %v685_v0 = vpop.f32.mrf.mxu1 }
 0x206   :  { %v692_v7 = vadd.f32 %v644_v52, %v2673_v2  ;;  %v694_v2 = vadd.f32 %v685_v0, %v3303_v9  ;;  %v3304_v52 = vsel %vm2667_vm4, %v2653_v19, %v2681_v17 }
 0x207   :  { %v646_v45 = vpop.f32.mrf.mxu0  ;;  %v687_v58 = vpop.f32.mrf.mxu1 }
 0x208   :  { %v1970_v62 = vmul.f32 -1.442695, %v692_v7  ;;  %v693_v57 = vadd.f32 %v646_v45, %v3302_v61  ;;  %v1972_v59 = vmul.f32 -1.442695, %v694_v2  ;;  %v695_v7 = vadd.f32 %v687_v58, %v3304_v52 }
 0x209   :  { %v648_v63 = vpop.f32.mrf.mxu0  ;;  %v689_v46 = vpop.f32.mrf.mxu1 }
 0x20a   :  { %2227 = vpow2.f32 %v1970_v62  ;;  %v1971_v54 = vmul.f32 -1.442695, %v693_v57 }
 0x20b   :  { %v649_v8 = vpop.f32.mrf.mxu0  ;;  %v690_v49 = vpop.f32.mrf.mxu1 }
 0x20c   :  { %2229 = vpow2.f32 %v1971_v54 }
 0x20d   :  { %2231 = vpow2.f32 %v1972_v59 }
 0x20e   :  { %2233 = vtanh.f32 %v695_v7 }
 0x217   :  { %v2228_v45 = vpop.eup %2227 }
 0x218   :  { %v705_v61 = vadd.f32 1.0, %v2228_v45  ;;  %v2115_v45 = vld [vmem:[#allocation4 + $0xe0] ss:$16 sps:$4 sm:$0xff]  }
 0x219   :  { %v2230_v62 = vpop.eup %2229 }
 0x21a   :  { %2235 = vrcp.f32 %v705_v61  ;;  %v706_v57 = vadd.f32 1.0, %v2230_v62  ;;  %v2232_v63 = vpop.eup %2231  ;;  %v2118_v61 = vld [vmem:[#allocation4 + $0xe8] ss:$16 sps:$4 sm:$0xff]   ;;  %v2123_v62 = vld [vmem:[#allocation4 + $0xc4] ss:$16 sps:$4 sm:$0xff]  }
 0x21b   :  { %v2234_v46 = vpop.eup %2233  ;;  %v707_v49 = vadd.f32 1.0, %v2232_v63  ;;  %v2121_v63 = vld [vmem:[#allocation4 + $0xc0] ss:$16 sps:$4 sm:$0xff]  }
 0x21c   :  { %2237 = vrcp.f32 %v706_v57  ;;  %v2126_v57 = vld [vmem:[#allocation4 + $0xcc] ss:$16 sps:$4 sm:$0xff]  }
 0x21d   :  { %2239 = vrcp.f32 %v707_v49  ;;  %v2130_v49 = vld [vmem:[#allocation4 + $0xa8] ss:$16 sps:$4 sm:$0xff]  }
 0x227   :  { %v2236_v54 = vpop.eup %2235 }
 0x228   :  { %v716_v8 = vmul.f32 %v2236_v54, %v2234_v46  ;;  %v2124_v46 = vld [vmem:[#allocation4 + $0xc8] ss:$16 sps:$4 sm:$0xff]   ;;  %v2129_v54 = vld [vmem:[#allocation4 + $0xa4] ss:$16 sps:$4 sm:$0xff]  }
 0x229   :  { %v2238_v0 = vpop.eup %2237 }
 0x22a   :  { %v715_v9 = vmul.f32 %v2238_v0, %v2747_v51  ;;  %v2240_v58 = vpop.eup %2239  ;;  %v2120_v51 = vld [vmem:[#allocation4 + $0xec] ss:$16 sps:$4 sm:$0xff]   ;;  %v2127_v0 = vld [vmem:[#allocation4 + $0xa0] ss:$16 sps:$4 sm:$0xff]  }
 0x22c   :  { %v2805_v2 = vadd.f32 %v716_v8, %v715_v9  ;;  %v2132_v8 = vld [vmem:[#allocation4 + $0xac] ss:$16 sps:$4 sm:$0xff]   ;;  %v2135_v9 = vld [vmem:[#allocation4 + $0x84] ss:$16 sps:$4 sm:$0xff]  }
 0x22e   :  { %2241 = vtanh.f32 %v2805_v2 }
 0x23b   :  { %v2242_v59 = vpop.eup %2241 }
 0x23c   :  { %v2808_v52 = vmul.f32 %v2242_v59, %v2240_v58  ;;  %v2133_v58 = vld [vmem:[#allocation4 + $0x80] ss:$16 sps:$4 sm:$0xff]   ;;  %v2136_v59 = vld [vmem:[#allocation4 + $0x88] ss:$16 sps:$4 sm:$0xff]  }
 0x23e   :  { %v720_v7 = vpack.c.bf16 %v2808_v52, %v2808_v52 }
 0x240   :  { %754 = vmatmul.mubr.bf16.vlgmr.msra.gmra.mxu0 %v720_v7  ;;  %795 = vmatmul.mubr.bf16.vlgmr.msra.gmra.mxu1 %v720_v7  ;;  %v2141_v7 = vld [vmem:[#allocation4 + $0x64] ss:$16 sps:$4 sm:$0xff]  }
 0x241   :  { %833 = vmatpush1.bf16.msra.mxu0 %v2482_v10  ;;  %874 = vmatpush1.bf16.msra.mxu1 %v2484_v11 }
 0x242   :  { %834 = vmatprep.subr.bf16.mxu0 %v2487_v12  ;;  %875 = vmatprep.subr.bf16.mxu1 %v2491_v13  ;;  %v3305_v12 = vld [vmem:[#allocation11_spill] sm:$0xff] }
 0x243   :  { %864 = vmatprep.mubr.bf16.mxu0 %v3301_v44  ;;  %905 = vmatprep.mubr.bf16.mxu1 %v3301_v44 }
 0x245   :  { %835 = vmatpush1.bf16.msra.mxu0 %v2495_v14  ;;  %876 = vmatpush1.bf16.msra.mxu1 %v2497_v15 }
 0x246   :  { %836 = vmatprep.subr.bf16.mxu0 %v2509_v18  ;;  %877 = vmatprep.subr.bf16.mxu1 %v2511_v20  ;;  %v3306_v20 = vsel %vm2661_vm3, %v2665_v1, %v2650_v6 }
 0x249   :  { %837 = vmatpush1.bf16.msra.mxu0 %v2513_v21  ;;  %878 = vmatpush1.bf16.msra.mxu1 %v2517_v22 }
 0x24a   :  { %838 = vmatprep.subr.bf16.mxu0 %v2521_v23  ;;  %879 = vmatprep.subr.bf16.mxu1 %v2524_v24 }
 0x24d   :  { %839 = vmatpush1.bf16.msra.mxu0 %v2529_v25  ;;  %880 = vmatpush1.bf16.msra.mxu1 %v2531_v26 }
 0x24e   :  { %840 = vmatprep.subr.bf16.mxu0 %v2535_v27  ;;  %881 = vmatprep.subr.bf16.mxu1 %v2538_v28  ;;  %v3307_v27 = vsel %vm2655_vm2, %v2659_v60, %v2648_v4 }
 0x251   :  { %841 = vmatpush1.bf16.msra.mxu0 %v2541_v29  ;;  %882 = vmatpush1.bf16.msra.mxu1 %v2545_v30  ;;  %v3308_v30 = vsel %vm2667_vm4, %v2681_v17, %v2653_v19  ;;  %v2117_v17 = vld [vmem:[#allocation4 + $0xe4] ss:$16 sps:$4 sm:$0xff]  }
 0x252   :  { %842 = vmatprep.subr.bf16.mxu0 %v2549_v31  ;;  %883 = vmatprep.subr.bf16.mxu1 %v2552_v32 }
 0x255   :  { %843 = vmatpush1.bf16.msra.mxu0 %v2555_v33  ;;  %884 = vmatpush1.bf16.msra.mxu1 %v2557_v34 }
 0x256   :  { %844 = vmatprep.subr.bf16.mxu0 %v2561_v35  ;;  %885 = vmatprep.subr.bf16.mxu1 %v2563_v36 }
 0x259   :  { %845 = vmatpush1.bf16.msra.mxu0 %v2566_v37  ;;  %886 = vmatpush1.bf16.msra.mxu1 %v2568_v38 }
 0x25a   :  { %846 = vmatprep.subr.bf16.mxu0 %v2570_v39  ;;  %887 = vmatprep.subr.bf16.mxu1 %v2573_v40 }
 0x25d   :  { %847 = vmatpush1.bf16.msra.mxu0 %v2578_v41  ;;  %888 = vmatpush1.bf16.msra.mxu1 %v2580_v42 }
 0x25e   :  { %1194 = vmatprep.subr.bf16.mxu0 %v2117_v17  ;;  %1247 = vmatprep.subr.bf16.mxu1 %v2120_v51 }
 0x300   :  { %v755_v10 = vpop.f32.mrf.mxu0  ;;  %v796_v11 = vpop.f32.mrf.mxu1 }
 0x301   :  { %v803_v13 = vadd.f32 %v755_v10, %v3305_v12  ;;  %v805_v28 = vadd.f32 %v796_v11, %v3307_v27  ;;  %v2144_v10 = vld [vmem:[#allocation4 + $0x6c] ss:$16 sps:$4 sm:$0xff]   ;;  %v2139_v11 = vld [vmem:[#allocation4 + $0x60] ss:$16 sps:$4 sm:$0xff]   ;;  %v2142_v12 = vld [vmem:[#allocation4 + $0x68] ss:$16 sps:$4 sm:$0xff]  }
 0x302   :  { %v757_v14 = vpop.f32.mrf.mxu0  ;;  %v798_v15 = vpop.f32.mrf.mxu1  ;;  %v2160_v27 = vld [vmem:[#allocation4 + $0x8] ss:$16 sps:$4 sm:$0xff]  }
 0x303   :  { %v1973_v18 = vmul.f32 -1.442695, %v803_v13  ;;  %v804_v21 = vadd.f32 %v757_v14, %v3306_v20  ;;  %v1975_v29 = vmul.f32 -1.442695, %v805_v28  ;;  %v806_v31 = vadd.f32 %v798_v15, %v3308_v30  ;;  %v2147_v13 = vld [vmem:[#allocation4 + $0x44] ss:$16 sps:$4 sm:$0xff]  }
 0x304   :  { %v759_v22 = vpop.f32.mrf.mxu0  ;;  %v800_v23 = vpop.f32.mrf.mxu1  ;;  %v2150_v14 = vld [vmem:[#allocation4 + $0x4c] ss:$16 sps:$4 sm:$0xff]   ;;  %v2145_v15 = vld [vmem:[#allocation4 + $0x40] ss:$16 sps:$4 sm:$0xff]   ;;  %v2153_v20 = vld [vmem:[#allocation4 + $0x24] ss:$16 sps:$4 sm:$0xff]  }
 0x305   :  { %2243 = vpow2.f32 %v1973_v18  ;;  %v1974_v24 = vmul.f32 -1.442695, %v804_v21  ;;  %v2148_v18 = vld [vmem:[#allocation4 + $0x48] ss:$16 sps:$4 sm:$0xff]   ;;  %v2156_v21 = vld [vmem:[#allocation4 + $0x2c] ss:$16 sps:$4 sm:$0xff]  }
 0x306   :  { %v760_v25 = vpop.f32.mrf.mxu0  ;;  %v801_v26 = vpop.f32.mrf.mxu1  ;;  %v2151_v22 = vld [vmem:[#allocation4 + $0x20] ss:$16 sps:$4 sm:$0xff]   ;;  %v2154_v23 = vld [vmem:[#allocation4 + $0x28] ss:$16 sps:$4 sm:$0xff]   ;;  %v2870_v28 = vld [vmem:[#allocation6 + $0xe4] ss:$16 sps:$4 sm:$0xff]  }
 0x307   :  { %2245 = vpow2.f32 %v1974_v24  ;;  %v2159_v24 = vld [vmem:[#allocation4 + $0x4] ss:$16 sps:$4 sm:$0xff]   ;;  %v2162_v25 = vld [vmem:[#allocation4 + $0xc] ss:$16 sps:$4 sm:$0xff]   ;;  %v2157_v26 = vld [vmem:[#allocation4] ss:$16 sps:$4 sm:$0xff]  }
 0x308   :  { %2247 = vpow2.f32 %v1975_v29  ;;  %v2872_v29 = vld [vmem:[#allocation6 + $0xec] ss:$16 sps:$4 sm:$0xff]  }
 0x309   :  { %2249 = vtanh.f32 %v806_v31 }
 0x312   :  { %v2244_v32 = vpop.eup %2243 }
 0x313   :  { %v816_v33 = vadd.f32 1.0, %v2244_v32  ;;  %v3309_v32 = vld [vmem:[#allocation12_spill] sm:$0xff] }
 0x314   :  { %v2246_v34 = vpop.eup %2245 }
 0x315   :  { %2251 = vrcp.f32 %v816_v33  ;;  %v817_v35 = vadd.f32 1.0, %v2246_v34  ;;  %v2248_v36 = vpop.eup %2247 }
 0x316   :  { %v2250_v37 = vpop.eup %2249  ;;  %v818_v41 = vadd.f32 1.0, %v2248_v36 }
 0x317   :  { %2253 = vrcp.f32 %v817_v35 }
 0x318   :  { %2255 = vrcp.f32 %v818_v41 }
 0x322   :  { %v2252_v38 = vpop.eup %2251 }
 0x323   :  { %v827_v39 = vmul.f32 %v2252_v38, %v2250_v37  ;;  %v3310_v37 = vsel %vm2661_vm3, %v2713_v53, %v2711_v5  ;;  %v3312_v53 = vsel %vm2667_vm4, %v2719_v47, %v2699_v43 }
 0x324   :  { %v2254_v40 = vpop.eup %2253 }
 0x325   :  { %v826_v42 = vmul.f32 %v2254_v40, %v2805_v2  ;;  %v2256_v6 = vpop.eup %2255  ;;  %v2138_v2 = vld [vmem:[#allocation4 + $0x8c] ss:$16 sps:$4 sm:$0xff]  }
 0x327   :  { %v2861_v4 = vadd.f32 %v827_v39, %v826_v42 }
 0x329   :  { %2257 = vtanh.f32 %v2861_v4 }
 0x336   :  { %v2258_v19 = vpop.eup %2257 }
 0x337   :  { %v2864_v60 = vmul.f32 %v2258_v19, %v2256_v6  ;;  %v3311_v19 = vsel %vm2655_vm2, %v2701_v16, %v2679_v50 }
 0x339   :  { %v831_v1 = vpack.c.bf16 %v2864_v60, %v2864_v60 }
 0x33b   :  { %865 = vmatmul.mubr.bf16.vlgmr.msra.gmra.mxu0 %v831_v1  ;;  %906 = vmatmul.mubr.bf16.vlgmr.msra.gmra.mxu1 %v831_v1 }
 0x33c   :  { %1226 = vmatprep.mubr.bf16.mxu0 %v3301_v44  ;;  %1279 = vmatprep.mubr.bf16.mxu1 %v3301_v44 }
 0x33d   :  { %1195 = vmatpush1.bf16.msra.mxu0 %v2115_v45  ;;  %1248 = vmatpush1.bf16.msra.mxu1 %v2118_v61 }
 0x33e   :  { %1196 = vmatprep.subr.bf16.mxu0 %v2123_v62  ;;  %1249 = vmatprep.subr.bf16.mxu1 %v2126_v57 }
 0x341   :  { %1197 = vmatpush1.bf16.msra.mxu0 %v2121_v63  ;;  %1250 = vmatpush1.bf16.msra.mxu1 %v2124_v46 }
 0x342   :  { %1198 = vmatprep.subr.bf16.mxu0 %v2129_v54  ;;  %1251 = vmatprep.subr.bf16.mxu1 %v2132_v8 }
 0x345   :  { %1199 = vmatpush1.bf16.msra.mxu0 %v2127_v0  ;;  %1252 = vmatpush1.bf16.msra.mxu1 %v2130_v49 }
 0x346   :  { %1200 = vmatprep.subr.bf16.mxu0 %v2135_v9  ;;  %1253 = vmatprep.subr.bf16.mxu1 %v2138_v2 }
 0x349   :  { %1201 = vmatpush1.bf16.msra.mxu0 %v2133_v58  ;;  %1254 = vmatpush1.bf16.msra.mxu1 %v2136_v59  ;;  %v943_v58 = vsel %vm121_vm1, %v2808_v52, %v2864_v60  ;;  %v2900_v59 = vld [vmem:[#allocation6 + $0xe0] ss:$16 sps:$4 sm:$0xff]  }
 0x34a   :  { %1202 = vmatprep.subr.bf16.mxu0 %v2141_v7  ;;  %1255 = vmatprep.subr.bf16.mxu1 %v2144_v10  ;;  %v2902_v7 = vld [vmem:[#allocation6 + $0xe8] ss:$16 sps:$4 sm:$0xff]  }
 0x34d   :  { %1203 = vmatpush1.bf16.msra.mxu0 %v2139_v11  ;;  %1256 = vmatpush1.bf16.msra.mxu1 %v2142_v12  ;;  %v2911_v12 = vld [vmem:[#allocation6 + $0xc4] ss:$16 sps:$4 sm:$0xff]  }
 0x34e   :  { %1204 = vmatprep.subr.bf16.mxu0 %v2147_v13  ;;  %1257 = vmatprep.subr.bf16.mxu1 %v2150_v14  ;;  %v2913_v13 = vld [vmem:[#allocation6 + $0xcc] ss:$16 sps:$4 sm:$0xff]  }
 0x351   :  { %1205 = vmatpush1.bf16.msra.mxu0 %v2145_v15  ;;  %1258 = vmatpush1.bf16.msra.mxu1 %v2148_v18  ;;  %v2917_v15 = vld [vmem:[#allocation6 + $0xc0] ss:$16 sps:$4 sm:$0xff]   ;;  %v2919_v18 = vld [vmem:[#allocation6 + $0xc8] ss:$16 sps:$4 sm:$0xff]  }
 0x352   :  { %1206 = vmatprep.subr.bf16.mxu0 %v2153_v20  ;;  %1259 = vmatprep.subr.bf16.mxu1 %v2156_v21  ;;  %v2933_v20 = vld [vmem:[#allocation6 + $0xa8] ss:$16 sps:$4 sm:$0xff]   ;;  %v2937_v21 = vld [vmem:[#allocation6 + $0x84] ss:$16 sps:$4 sm:$0xff]  }
 0x355   :  { %1207 = vmatpush1.bf16.msra.mxu0 %v2151_v22  ;;  %1260 = vmatpush1.bf16.msra.mxu1 %v2154_v23  ;;  %v2939_v22 = vld [vmem:[#allocation6 + $0x8c] ss:$16 sps:$4 sm:$0xff]   ;;  %v2943_v23 = vld [vmem:[#allocation6 + $0x80] ss:$16 sps:$4 sm:$0xff]  }
 0x356   :  { %1208 = vmatprep.subr.bf16.mxu0 %v2159_v24  ;;  %1261 = vmatprep.subr.bf16.mxu1 %v2162_v25  ;;  %v2945_v24 = vld [vmem:[#allocation6 + $0x88] ss:$16 sps:$4 sm:$0xff]   ;;  %v2949_v25 = vld [vmem:[#allocation6 + $0x64] ss:$16 sps:$4 sm:$0xff]  }
 0x359   :  { %1209 = vmatpush1.bf16.msra.mxu0 %v2157_v26  ;;  %1262 = vmatpush1.bf16.msra.mxu1 %v2160_v27  ;;  %v2951_v26 = vld [vmem:[#allocation6 + $0x6c] ss:$16 sps:$4 sm:$0xff]   ;;  %v2957_v27 = vld [vmem:[#allocation6 + $0x60] ss:$16 sps:$4 sm:$0xff]  }
 0x35a   :  { %1476 = vmatprep.subr.bf16.mxu0 %v2870_v28  ;;  %1517 = vmatprep.subr.bf16.mxu1 %v2872_v29 }
 0x3fb   :  { %v866_v30 = vpop.f32.mrf.mxu0  ;;  %v907_v31 = vpop.f32.mrf.mxu1 }
 0x3fc   :  { %v914_v33 = vadd.f32 %v866_v30, %v3309_v32  ;;  %v916_v1 = vadd.f32 %v907_v31, %v3311_v19  ;;  %v2959_v30 = vld [vmem:[#allocation6 + $0x68] ss:$16 sps:$4 sm:$0xff]   ;;  %v2963_v31 = vld [vmem:[#allocation6 + $0x44] ss:$16 sps:$4 sm:$0xff]   ;;  %v2965_v32 = vld [vmem:[#allocation6 + $0x4c] ss:$16 sps:$4 sm:$0xff]  }
 0x3fd   :  { %v868_v34 = vpop.f32.mrf.mxu0  ;;  %v909_v35 = vpop.f32.mrf.mxu1 }
 0x3fe   :  { %v1976_v36 = vmul.f32 -1.442695, %v914_v33  ;;  %v915_v38 = vadd.f32 %v868_v34, %v3310_v37  ;;  %v1978_v17 = vmul.f32 -1.442695, %v916_v1  ;;  %v917_v5 = vadd.f32 %v909_v35, %v3312_v53  ;;  %v2969_v33 = vld [vmem:[#allocation6 + $0x40] ss:$16 sps:$4 sm:$0xff]  }
 0x3ff   :  { %v870_v39 = vpop.f32.mrf.mxu0  ;;  %v911_v40 = vpop.f32.mrf.mxu1  ;;  %v2971_v34 = vld [vmem:[#allocation6 + $0x48] ss:$16 sps:$4 sm:$0xff]   ;;  %v2975_v35 = vld [vmem:[#allocation6 + $0x24] ss:$16 sps:$4 sm:$0xff]   ;;  %v2981_v37 = vld [vmem:[#allocation6 + $0x20] ss:$16 sps:$4 sm:$0xff]  }
 0x400   :  { %2259 = vpow2.f32 %v1976_v36  ;;  %v1977_v41 = vmul.f32 -1.442695, %v915_v38  ;;  %v2977_v36 = vld [vmem:[#allocation6 + $0x2c] ss:$16 sps:$4 sm:$0xff]   ;;  %v2983_v38 = vld [vmem:[#allocation6 + $0x28] ss:$16 sps:$4 sm:$0xff]  }
 0x401   :  { %v871_v42 = vpop.f32.mrf.mxu0  ;;  %v912_v6 = vpop.f32.mrf.mxu1  ;;  %v2987_v39 = vld [vmem:[#allocation6 + $0x4] ss:$16 sps:$4 sm:$0xff]   ;;  %v2989_v40 = vld [vmem:[#allocation6 + $0xc] ss:$16 sps:$4 sm:$0xff]  }
 0x402   :  { %2261 = vpow2.f32 %v1977_v41  ;;  %v2993_v41 = vld [vmem:[#allocation6] ss:$16 sps:$4 sm:$0xff]   ;;  %v2995_v42 = vld [vmem:[#allocation6 + $0x8] ss:$16 sps:$4 sm:$0xff]  }
 0x403   :  { %2263 = vpow2.f32 %v1978_v17  ;;  %v1010_v6 = vld [vmem:[%s3274_s6] sm:$0xf] }
 0x404   :  { %2265 = vtanh.f32 %v917_v5  ;;  %v3314_v5 = vld [vmem:[#allocation9_spill] sm:$0xff] }
 0x40d   :  { %v2260_v51 = vpop.eup %2259 }
 0x40e   :  { %v927_v45 = vadd.f32 1.0, %v2260_v51  ;;  %v3315_v51 = vsub.s32 0, %v3314_v5 }
 0x40f   :  { %v2262_v61 = vpop.eup %2261 }
 0x410   :  { %2267 = vrcp.f32 %v927_v45  ;;  %v928_v62 = vadd.f32 1.0, %v2262_v61  ;;  %v2264_v57 = vpop.eup %2263  ;;  %v1017_v45 = vrot.slane %v1010_v6, %v3315_v51  ;;  %v3316_v61 = vsub.s32 2, %v3314_v5 }
 0x411   :  { %v2266_v63 = vpop.eup %2265  ;;  %v929_v54 = vadd.f32 1.0, %v2264_v57 }
 0x412   :  { %2269 = vrcp.f32 %v928_v62  ;;  %v1025_v62 = vrot.slane %v1010_v6, %v3316_v61 }
 0x413   :  { %2271 = vrcp.f32 %v929_v54 }
 0x41d   :  { %v2268_v46 = vpop.eup %2267 }
 0x41e   :  { %v938_v50 = vmul.f32 %v2268_v46, %v2266_v63  ;;  %v3317_v46 = vsub.s32 1, %v3314_v5 }
 0x41f   :  { %v2270_v16 = vpop.eup %2269 }
 0x420   :  { %v937_v8 = vmul.f32 %v2270_v16, %v2861_v4  ;;  %v2272_v43 = vpop.eup %2271  ;;  %v944_v4 = vsel %vm121_vm1, %v2864_v60, %v2808_v52  ;;  %v2925_v52 = vld [vmem:[#allocation6 + $0xac] ss:$16 sps:$4 sm:$0xff]   ;;  %v2931_v60 = vld [vmem:[#allocation6 + $0xa0] ss:$16 sps:$4 sm:$0xff]   ;;  %v3318_v16 = vsub.s32 3, %v3314_v5 }
 0x422   :  { %v939_v0 = vadd.f32 %v938_v50, %v937_v8  ;;  %v1021_v50 = vrot.slane %v1010_v6, %v3317_v46  ;;  %v1029_v54 = vrot.slane %v1010_v6, %v3318_v16 }
 0x424   :  { %2273 = vtanh.f32 %v939_v0 }
 0x431   :  { %v2274_v47 = vpop.eup %2273 }
 0x432   :  { %v941_v49 = vmul.f32 %v2274_v47, %v2272_v43 }
 0x434   :  { %v942_v2 = vsel %vm121_vm1, %v2750_v55, %v941_v49  ;;  %v945_v10 = vsel %vm121_vm1, %v941_v49, %v2750_v55  ;;  %v2923_v55 = vld [vmem:[#allocation6 + $0xa4] ss:$16 sps:$4 sm:$0xff]  }
 0x435   :  { %v1011_v11 = vpack.c.bf16 %v943_v58, %v942_v2  ;;  %v1012_v14 = vpack.c.bf16 %v945_v10, %v944_v4 }
 0x437   :  { %1227 = vmatmul.mubr.bf16.vlgmr.msra.gmra.mxu0 %v1011_v11  ;;  %1280 = vmatmul.mubr.bf16.vlgmr.msra.gmra.mxu1 %v1011_v11 }
 0x438   :  { %1477 = vmatpush1.bf16.msra.mxu0 %v2900_v59  ;;  %1518 = vmatpush1.bf16.msra.mxu1 %v2902_v7 }
 0x439   :  { %1478 = vmatprep.subr.bf16.mxu0 %v2911_v12  ;;  %1519 = vmatprep.subr.bf16.mxu1 %v2913_v13 }
 0x43a   :  { %1236 = vmatprep.mubr.bf16.mxu0 %v3301_v44  ;;  %1289 = vmatprep.mubr.bf16.mxu1 %v3301_v44 }
 0x43c   :  { %1479 = vmatpush1.bf16.msra.mxu0 %v2917_v15  ;;  %1520 = vmatpush1.bf16.msra.mxu1 %v2919_v18 }
 0x43d   :  { %1480 = vmatprep.subr.bf16.mxu0 %v2923_v55  ;;  %1521 = vmatprep.subr.bf16.mxu1 %v2925_v52 }
 0x43f   :  { %1237 = vmatmul.mubr.bf16.gmra.mxu0 %v1012_v14  ;;  %1290 = vmatmul.mubr.bf16.gmra.mxu1 %v1012_v14 }
 0x440   :  { %1481 = vmatpush1.bf16.msra.mxu0 %v2931_v60  ;;  %1522 = vmatpush1.bf16.msra.mxu1 %v2933_v20 }
 0x441   :  { %1482 = vmatprep.subr.bf16.mxu0 %v2937_v21  ;;  %1523 = vmatprep.subr.bf16.mxu1 %v2939_v22 }
 0x442   :  { %1508 = vmatprep.mubr.bf16.mxu0 %v3301_v44  ;;  %1549 = vmatprep.mubr.bf16.mxu1 %v3301_v44 }
 0x444   :  { %1483 = vmatpush1.bf16.msra.mxu0 %v2943_v23  ;;  %1524 = vmatpush1.bf16.msra.mxu1 %v2945_v24 }
 0x445   :  { %1484 = vmatprep.subr.bf16.mxu0 %v2949_v25  ;;  %1525 = vmatprep.subr.bf16.mxu1 %v2951_v26 }
 0x448   :  { %1485 = vmatpush1.bf16.msra.mxu0 %v2957_v27  ;;  %1526 = vmatpush1.bf16.msra.mxu1 %v2959_v30 }
 0x449   :  { %1486 = vmatprep.subr.bf16.mxu0 %v2963_v31  ;;  %1527 = vmatprep.subr.bf16.mxu1 %v2965_v32 }
 0x44c   :  { %1487 = vmatpush1.bf16.msra.mxu0 %v2969_v33  ;;  %1528 = vmatpush1.bf16.msra.mxu1 %v2971_v34 }
 0x44d   :  { %1488 = vmatprep.subr.bf16.mxu0 %v2975_v35  ;;  %1529 = vmatprep.subr.bf16.mxu1 %v2977_v36 }
 0x450   :  { %1489 = vmatpush1.bf16.msra.mxu0 %v2981_v37  ;;  %1530 = vmatpush1.bf16.msra.mxu1 %v2983_v38 }
 0x451   :  { %1490 = vmatprep.subr.bf16.mxu0 %v2987_v39  ;;  %1531 = vmatprep.subr.bf16.mxu1 %v2989_v40 }
 0x454   :  { %1491 = vmatpush1.bf16.msra.mxu0 %v2993_v41  ;;  %1532 = vmatpush1.bf16.msra.mxu1 %v2995_v42 }
 0x455   :  { %1587 = vmatprep.subr.bf16.mxu0 %v2870_v28  ;;  %1628 = vmatprep.subr.bf16.mxu1 %v2872_v29 }
 0x457   :  { %1509 = vmatmul.mubr.bf16.vlgmr.msra.gmra.mxu0 %v3301_v44  ;;  %1550 = vmatmul.mubr.bf16.vlgmr.msra.gmra.mxu1 %v3301_v44 }
 0x458   :  { %1588 = vmatpush1.bf16.msra.mxu0 %v2900_v59  ;;  %1629 = vmatpush1.bf16.msra.mxu1 %v2902_v7 }
 0x459   :  { %1589 = vmatprep.subr.bf16.mxu0 %v2911_v12  ;;  %1630 = vmatprep.subr.bf16.mxu1 %v2913_v13 }
 0x45a   :  { %1619 = vmatprep.mubr.bf16.mxu0 %v3301_v44  ;;  %1660 = vmatprep.mubr.bf16.mxu1 %v3301_v44 }
 0x45c   :  { %1590 = vmatpush1.bf16.msra.mxu0 %v2917_v15  ;;  %1631 = vmatpush1.bf16.msra.mxu1 %v2919_v18 }
 0x45d   :  { %1591 = vmatprep.subr.bf16.mxu0 %v2923_v55  ;;  %1632 = vmatprep.subr.bf16.mxu1 %v2925_v52 }
 0x460   :  { %1592 = vmatpush1.bf16.msra.mxu0 %v2931_v60  ;;  %1633 = vmatpush1.bf16.msra.mxu1 %v2933_v20 }
 0x461   :  { %1593 = vmatprep.subr.bf16.mxu0 %v2937_v21  ;;  %1634 = vmatprep.subr.bf16.mxu1 %v2939_v22 }
 0x464   :  { %1594 = vmatpush1.bf16.msra.mxu0 %v2943_v23  ;;  %1635 = vmatpush1.bf16.msra.mxu1 %v2945_v24 }
 0x465   :  { %1595 = vmatprep.subr.bf16.mxu0 %v2949_v25  ;;  %1636 = vmatprep.subr.bf16.mxu1 %v2951_v26 }
 0x468   :  { %1596 = vmatpush1.bf16.msra.mxu0 %v2957_v27  ;;  %1637 = vmatpush1.bf16.msra.mxu1 %v2959_v30 }
 0x469   :  { %1597 = vmatprep.subr.bf16.mxu0 %v2963_v31  ;;  %1638 = vmatprep.subr.bf16.mxu1 %v2965_v32 }
 0x46c   :  { %1598 = vmatpush1.bf16.msra.mxu0 %v2969_v33  ;;  %1639 = vmatpush1.bf16.msra.mxu1 %v2971_v34 }
 0x46d   :  { %1599 = vmatprep.subr.bf16.mxu0 %v2975_v35  ;;  %1640 = vmatprep.subr.bf16.mxu1 %v2977_v36 }
 0x470   :  { %1600 = vmatpush1.bf16.msra.mxu0 %v2981_v37  ;;  %1641 = vmatpush1.bf16.msra.mxu1 %v2983_v38 }
 0x471   :  { %1601 = vmatprep.subr.bf16.mxu0 %v2987_v39  ;;  %1642 = vmatprep.subr.bf16.mxu1 %v2989_v40 }
 0x474   :  { %1602 = vmatpush1.bf16.msra.mxu0 %v2993_v41  ;;  %1643 = vmatpush1.bf16.msra.mxu1 %v2995_v42 }
 0x475   :  { %1698 = vmatprep.subr.bf16.mxu0 %v2870_v28  ;;  %1739 = vmatprep.subr.bf16.mxu1 %v2872_v29 }
 0x4f7   :  { %v1228_v19 = vpop.f32.mrf.mxu0  ;;  %v1281_v1 = vpop.f32.mrf.mxu1 }
 0x4f9   :  { %v1230_v17 = vpop.f32.mrf.mxu0  ;;  %v1283_v53 = vpop.f32.mrf.mxu1 }
 0x4fb   :  { %v1232_v57 = vpop.f32.mrf.mxu0  ;;  %v1285_v63 = vpop.f32.mrf.mxu1 }
 0x4fc   :  { %v1233_v8 = vadd.f32 %v1232_v57, %v1017_v45  ;;  %v3050_v0 = vadd.f32 %v1285_v63, %v1025_v62 }
 0x4fd   :  { %v1234_v43 = vpop.f32.mrf.mxu0  ;;  %v1287_v47 = vpop.f32.mrf.mxu1 }
 0x4fe   :  { %v3052_v49 = vadd.f32 %v1234_v43, %v1021_v50  ;;  %v3054_v2 = vadd.f32 %v1287_v47, %v1029_v54  ;;  %v3098_v43 = vadd.f32 %v1230_v17, %v1021_v50 }
 0x4ff   :  { %v1238_v58 = vpop.f32.mrf.mxu0  ;;  %v1291_v4 = vpop.f32.mrf.mxu1 }
 0x500   :  { %3319 = vst [vmem:[#allocation11_spill] sm:$0xff] %v3054_v2  ;;  %v1239_v10 = vadd.f32 %v1238_v58, %v1017_v45  ;;  %v3056_v11 = vadd.f32 %v1291_v4, %v1025_v62  ;;  %v3100_v4 = vadd.f32 %v1283_v53, %v1029_v54 }
 0x501   :  { %v1240_v14 = vpop.f32.mrf.mxu0  ;;  %v1293_v51 = vpop.f32.mrf.mxu1 }
 0x502   :  { %v3058_v61 = vadd.f32 %v1240_v14, %v1021_v50  ;;  %v3060_v5 = vadd.f32 %v1293_v51, %v1029_v54  ;;  %v3064_v6 = vsel %vm121_vm1, %v1233_v8, %v1239_v10  ;;  %v3072_v16 = vsel %vm121_vm1, %v1239_v10, %v1233_v8 }
 0x503   :  { %v1242_v63 = vpop.f32.mrf.mxu0  ;;  %v1295_v46 = vpop.f32.mrf.mxu1  ;;  %3321 = vst [vmem:[#allocation9_spill] sm:$0xff] %v3072_v16  ;;  %v1229_v8 = vadd.f32 %v1228_v19, %v1017_v45  ;;  %v3088_v10 = vadd.f32 %v1281_v1, %v1025_v62 }
 0x504   :  { %3320 = vst [vmem:[#allocation12_spill] sm:$0xff] %v3060_v5  ;;  %v1243_v47 = vadd.f32 %v1242_v63, %v1017_v45  ;;  %v3078_v58 = vadd.f32 %v1295_v46, %v1025_v62 }
 0x505   :  { %v1244_v51 = vpop.f32.mrf.mxu0  ;;  %v1297_v57 = vpop.f32.mrf.mxu1 }
 0x506   :  { %v3102_v14 = vadd.f32 %v1244_v51, %v1021_v50  ;;  %v3104_v19 = vadd.f32 %v1297_v57, %v1029_v54  ;;  %v3108_v1 = vsel %vm121_vm1, %v1243_v47, %v1229_v8  ;;  %v1300_v62 = vsel %vm121_vm1, %v1229_v8, %v1243_v47 }
 0x507   :  { %3322 = vst [vmem:[#allocation13_spill] sm:$0xff] %v3108_v1  ;;  %v1302_v47 = vsel %vm2655_vm2, %v3088_v10, %v3078_v58 }
 0x508   :  { %v1301_v51 = vsel %vm2661_vm3, %v3098_v43, %v3102_v14  ;;  %v3335_v56 = vsel %vm2667_vm4, %v3104_v19, %v3100_v4 }
 0x517   :  { %v1510_v50 = vpop.f32.mrf.mxu0  ;;  %v1551_v54 = vpop.f32.mrf.mxu1 }
 0x518   :  { %v1558_v57 = vadd.f32 %v1510_v50, %v1300_v62  ;;  %v1560_v8 = vadd.f32 %v1551_v54, %v1302_v47  ;;  %v1303_v50 = vsel %vm2667_vm4, %v3100_v4, %v3104_v19 }
 0x519   :  { %v1512_v45 = vpop.f32.mrf.mxu0  ;;  %v1553_v46 = vpop.f32.mrf.mxu1 }
 0x51a   :  { %v2043_v63 = vmul.f32 -1.442695, %v1558_v57  ;;  %v1559_v17 = vadd.f32 %v1512_v45, %v1301_v51  ;;  %v2045_v62 = vmul.f32 -1.442695, %v1560_v8 }
 0x51b   :  { %v1514_v1 = vpop.f32.mrf.mxu0  ;;  %v1555_v16 = vpop.f32.mrf.mxu1 }
 0x51c   :  { %2275 = vpow2.f32 %v2043_v63  ;;  %v2044_v5 = vmul.f32 -1.442695, %v1559_v17  ;;  %v1561_v1 = vadd.f32 %v1553_v46, %v1303_v50 }
 0x51d   :  { %v1515_v53 = vpop.f32.mrf.mxu0  ;;  %v1556_v2 = vpop.f32.mrf.mxu1 }
 0x51e   :  { %2277 = vpow2.f32 %v2044_v5 }
 0x51f   :  { %2279 = vpow2.f32 %v2045_v62 }
 0x529   :  { %v2276_v45 = vpop.eup %2275 }
 0x52a   :  { %v1571_v16 = vadd.f32 1.0, %v2276_v45 }
 0x52b   :  { %v2278_v63 = vpop.eup %2277 }
 0x52c   :  { %2281 = vrcp.f32 %v1571_v16  ;;  %v1572_v2 = vadd.f32 1.0, %v2278_v63  ;;  %v2280_v5 = vpop.eup %2279 }
 0x52d   :  { %2283 = vtanh.f32 %v1561_v1  ;;  %v1573_v54 = vadd.f32 1.0, %v2280_v5 }
 0x52e   :  { %2285 = vrcp.f32 %v1572_v2 }
 0x52f   :  { %2287 = vrcp.f32 %v1573_v54 }
 0x539   :  { %v2282_v17 = vpop.eup %2281 }
 0x53a   :  { %v2284_v53 = vpop.eup %2283 }
 0x53b   :  { %v2286_v57 = vpop.eup %2285  ;;  %v1582_v47 = vmul.f32 %v2284_v53, %v2282_v17  ;;  %v3323_v53 = vsel %vm2661_vm3, %v3052_v49, %v3058_v61 }
 0x53c   :  { %v1581_v51 = vmul.f32 0.0, %v2286_v57  ;;  %v2288_v46 = vpop.eup %2287 }
 0x53e   :  { %v3136_v8 = vadd.f32 %v1582_v47, %v1581_v51 }
 0x540   :  { %2289 = vtanh.f32 %v3136_v8 }
 0x54d   :  { %v2290_v50 = vpop.eup %2289 }
 0x54e   :  { %v3139_v45 = vmul.f32 %v2290_v50, %v2288_v46 }
 0x550   :  { %v1586_v62 = vpack.c.bf16 %v3139_v45, %v3139_v45 }
 0x552   :  { %1620 = vmatmul.mubr.bf16.vlgmr.msra.gmra.mxu0 %v1586_v62  ;;  %1661 = vmatmul.mubr.bf16.vlgmr.msra.gmra.mxu1 %v1586_v62  ;;  %v3325_v62 = vld [vmem:[#allocation11_spill] sm:$0xff] }
 0x553   :  { %1699 = vmatpush1.bf16.msra.mxu0 %v2900_v59  ;;  %1740 = vmatpush1.bf16.msra.mxu1 %v2902_v7 }
 0x554   :  { %1700 = vmatprep.subr.bf16.mxu0 %v2911_v12  ;;  %1741 = vmatprep.subr.bf16.mxu1 %v2913_v13 }
 0x555   :  { %1730 = vmatprep.mubr.bf16.mxu0 %v3301_v44  ;;  %1771 = vmatprep.mubr.bf16.mxu1 %v3301_v44 }
 0x557   :  { %1701 = vmatpush1.bf16.msra.mxu0 %v2917_v15  ;;  %1742 = vmatpush1.bf16.msra.mxu1 %v2919_v18 }
 0x558   :  { %1702 = vmatprep.subr.bf16.mxu0 %v2923_v55  ;;  %1743 = vmatprep.subr.bf16.mxu1 %v2925_v52 }
 0x55b   :  { %1703 = vmatpush1.bf16.msra.mxu0 %v2931_v60  ;;  %1744 = vmatpush1.bf16.msra.mxu1 %v2933_v20 }
 0x55c   :  { %1704 = vmatprep.subr.bf16.mxu0 %v2937_v21  ;;  %1745 = vmatprep.subr.bf16.mxu1 %v2939_v22 }
 0x55f   :  { %1705 = vmatpush1.bf16.msra.mxu0 %v2943_v23  ;;  %1746 = vmatpush1.bf16.msra.mxu1 %v2945_v24 }
 0x560   :  { %1706 = vmatprep.subr.bf16.mxu0 %v2949_v25  ;;  %1747 = vmatprep.subr.bf16.mxu1 %v2951_v26 }
 0x563   :  { %1707 = vmatpush1.bf16.msra.mxu0 %v2957_v27  ;;  %1748 = vmatpush1.bf16.msra.mxu1 %v2959_v30 }
 0x564   :  { %1708 = vmatprep.subr.bf16.mxu0 %v2963_v31  ;;  %1749 = vmatprep.subr.bf16.mxu1 %v2965_v32 }
 0x567   :  { %1709 = vmatpush1.bf16.msra.mxu0 %v2969_v33  ;;  %1750 = vmatpush1.bf16.msra.mxu1 %v2971_v34 }
 0x568   :  { %1710 = vmatprep.subr.bf16.mxu0 %v2975_v35  ;;  %1751 = vmatprep.subr.bf16.mxu1 %v2977_v36 }
 0x56b   :  { %1711 = vmatpush1.bf16.msra.mxu0 %v2981_v37  ;;  %1752 = vmatpush1.bf16.msra.mxu1 %v2983_v38 }
 0x56c   :  { %1712 = vmatprep.subr.bf16.mxu0 %v2987_v39  ;;  %1753 = vmatprep.subr.bf16.mxu1 %v2989_v40 }
 0x56f   :  { %1713 = vmatpush1.bf16.msra.mxu0 %v2993_v41  ;;  %1754 = vmatpush1.bf16.msra.mxu1 %v2995_v42 }
 0x570   :  { %1809 = vmatprep.subr.bf16.mxu0 %v2870_v28  ;;  %1850 = vmatprep.subr.bf16.mxu1 %v2872_v29  ;;  %v3324_v29 = vsel %vm2655_vm2, %v3050_v0, %v3056_v11 }
 0x612   :  { %v1621_v1 = vpop.f32.mrf.mxu0  ;;  %v1662_v16 = vpop.f32.mrf.mxu1 }
 0x613   :  { %v1669_v63 = vadd.f32 %v1621_v1, %v3064_v6  ;;  %v1671_v6 = vadd.f32 %v1662_v16, %v3324_v29  ;;  %v3326_v1 = vld [vmem:[#allocation12_spill] sm:$0xff] }
 0x614   :  { %v1623_v2 = vpop.f32.mrf.mxu0  ;;  %v1664_v5 = vpop.f32.mrf.mxu1 }
 0x615   :  { %v2046_v17 = vmul.f32 -1.442695, %v1669_v63  ;;  %v1670_v57 = vadd.f32 %v1623_v2, %v3323_v53  ;;  %v2048_v50 = vmul.f32 -1.442695, %v1671_v6  ;;  %v3327_v63 = vsel %vm2667_vm4, %v3325_v62, %v3326_v1 }
 0x616   :  { %v1625_v54 = vpop.f32.mrf.mxu0  ;;  %v1666_v51 = vpop.f32.mrf.mxu1  ;;  %v1672_v2 = vadd.f32 %v1664_v5, %v3327_v63 }
 0x617   :  { %2291 = vpow2.f32 %v2046_v17  ;;  %v2047_v47 = vmul.f32 -1.442695, %v1670_v57 }
 0x618   :  { %v1626_v28 = vpop.f32.mrf.mxu0  ;;  %v1667_v46 = vpop.f32.mrf.mxu1 }
 0x619   :  { %2293 = vpow2.f32 %v2047_v47 }
 0x61a   :  { %2295 = vpow2.f32 %v2048_v50 }
 0x61b   :  { %2297 = vtanh.f32 %v1672_v2 }
 0x624   :  { %v2292_v53 = vpop.eup %2291 }
 0x625   :  { %v1682_v54 = vadd.f32 1.0, %v2292_v53 }
 0x626   :  { %v2294_v17 = vpop.eup %2293 }
 0x627   :  { %2299 = vrcp.f32 %v1682_v54  ;;  %v1683_v57 = vadd.f32 1.0, %v2294_v17  ;;  %v2296_v51 = vpop.eup %2295 }
 0x628   :  { %v2298_v47 = vpop.eup %2297  ;;  %v1684_v29 = vadd.f32 1.0, %v2296_v51 }
 0x629   :  { %2301 = vrcp.f32 %v1683_v57 }
 0x62a   :  { %2303 = vrcp.f32 %v1684_v29 }
 0x634   :  { %v2300_v28 = vpop.eup %2299 }
 0x635   :  { %v1693_v46 = vmul.f32 %v2300_v28, %v2298_v47 }
 0x636   :  { %v2302_v16 = vpop.eup %2301 }
 0x637   :  { %v1692_v6 = vmul.f32 %v2302_v16, %v3136_v8  ;;  %v2304_v5 = vpop.eup %2303 }
 0x639   :  { %v3194_v9 = vadd.f32 %v1693_v46, %v1692_v6  ;;  %v3334_v6 = vsel %vm2655_vm2, %v3078_v58, %v3088_v10 }
 0x63b   :  { %2305 = vtanh.f32 %v3194_v9 }
 0x648   :  { %v2306_v50 = vpop.eup %2305 }
 0x649   :  { %v1696_v63 = vmul.f32 %v2306_v50, %v2304_v5 }
 0x64b   :  { %v1697_v2 = vpack.c.bf16 %v1696_v63, %v1696_v63 }
 0x64d   :  { %1731 = vmatmul.mubr.bf16.vlgmr.msra.gmra.mxu0 %v1697_v2  ;;  %1772 = vmatmul.mubr.bf16.vlgmr.msra.gmra.mxu1 %v1697_v2 }
 0x64e   :  { %1810 = vmatpush1.bf16.msra.mxu0 %v2900_v59  ;;  %1851 = vmatpush1.bf16.msra.mxu1 %v2902_v7  ;;  %v3328_v7 = vld [vmem:[#allocation9_spill] sm:$0xff] }
 0x64f   :  { %1811 = vmatprep.subr.bf16.mxu0 %v2911_v12  ;;  %1852 = vmatprep.subr.bf16.mxu1 %v2913_v13 }
 0x650   :  { %1841 = vmatprep.mubr.bf16.mxu0 %v3301_v44  ;;  %1882 = vmatprep.mubr.bf16.mxu1 %v3301_v44 }
 0x652   :  { %1812 = vmatpush1.bf16.msra.mxu0 %v2917_v15  ;;  %1853 = vmatpush1.bf16.msra.mxu1 %v2919_v18 }
 0x653   :  { %1813 = vmatprep.subr.bf16.mxu0 %v2923_v55  ;;  %1854 = vmatprep.subr.bf16.mxu1 %v2925_v52  ;;  %v3329_v55 = vsel %vm2661_vm3, %v3058_v61, %v3052_v49 }
 0x656   :  { %1814 = vmatpush1.bf16.msra.mxu0 %v2931_v60  ;;  %1855 = vmatpush1.bf16.msra.mxu1 %v2933_v20 }
 0x657   :  { %1815 = vmatprep.subr.bf16.mxu0 %v2937_v21  ;;  %1856 = vmatprep.subr.bf16.mxu1 %v2939_v22 }
 0x65a   :  { %1816 = vmatpush1.bf16.msra.mxu0 %v2943_v23  ;;  %1857 = vmatpush1.bf16.msra.mxu1 %v2945_v24  ;;  %v3330_v24 = vsel %vm2655_vm2, %v3056_v11, %v3050_v0 }
 0x65b   :  { %1817 = vmatprep.subr.bf16.mxu0 %v2949_v25  ;;  %1858 = vmatprep.subr.bf16.mxu1 %v2951_v26 }
 0x65e   :  { %1818 = vmatpush1.bf16.msra.mxu0 %v2957_v27  ;;  %1859 = vmatpush1.bf16.msra.mxu1 %v2959_v30  ;;  %v3331_v27 = vsel %vm2667_vm4, %v3326_v1, %v3325_v62  ;;  %v3332_v1 = vld [vmem:[#allocation13_spill] sm:$0xff] }
 0x65f   :  { %1819 = vmatprep.subr.bf16.mxu0 %v2963_v31  ;;  %1860 = vmatprep.subr.bf16.mxu1 %v2965_v32 }
 0x662   :  { %1820 = vmatpush1.bf16.msra.mxu0 %v2969_v33  ;;  %1861 = vmatpush1.bf16.msra.mxu1 %v2971_v34 }
 0x663   :  { %1821 = vmatprep.subr.bf16.mxu0 %v2975_v35  ;;  %1862 = vmatprep.subr.bf16.mxu1 %v2977_v36 }
 0x666   :  { %1822 = vmatpush1.bf16.msra.mxu0 %v2981_v37  ;;  %1863 = vmatpush1.bf16.msra.mxu1 %v2983_v38 }
 0x667   :  { %1823 = vmatprep.subr.bf16.mxu0 %v2987_v39  ;;  %1864 = vmatprep.subr.bf16.mxu1 %v2989_v40 }
 0x66a   :  { %1824 = vmatpush1.bf16.msra.mxu0 %v2993_v41  ;;  %1865 = vmatpush1.bf16.msra.mxu1 %v2995_v42 }
 0x70d   :  { %v1732_v44 = vpop.f32.mrf.mxu0  ;;  %v1773_v59 = vpop.f32.mrf.mxu1 }
 0x70e   :  { %v1780_v12 = vadd.f32 %v1732_v44, %v3328_v7  ;;  %v1782_v25 = vadd.f32 %v1773_v59, %v3330_v24 }
 0x70f   :  { %v1734_v13 = vpop.f32.mrf.mxu0  ;;  %v1775_v15 = vpop.f32.mrf.mxu1 }
 0x710   :  { %v2049_v18 = vmul.f32 -1.442695, %v1780_v12  ;;  %v1781_v52 = vadd.f32 %v1734_v13, %v3329_v55  ;;  %v2051_v26 = vmul.f32 -1.442695, %v1782_v25  ;;  %v1783_v30 = vadd.f32 %v1775_v15, %v3331_v27 }
 0x711   :  { %v1736_v60 = vpop.f32.mrf.mxu0  ;;  %v1777_v20 = vpop.f32.mrf.mxu1 }
 0x712   :  { %2307 = vpow2.f32 %v2049_v18  ;;  %v2050_v21 = vmul.f32 -1.442695, %v1781_v52 }
 0x713   :  { %v1737_v22 = vpop.f32.mrf.mxu0  ;;  %v1778_v23 = vpop.f32.mrf.mxu1 }
 0x714   :  { %2309 = vpow2.f32 %v2050_v21 }
 0x715   :  { %2311 = vpow2.f32 %v2051_v26 }
 0x716   :  { %2313 = vtanh.f32 %v1783_v30 }
 0x71f   :  { %v2308_v31 = vpop.eup %2307 }
 0x720   :  { %v1793_v32 = vadd.f32 1.0, %v2308_v31 }
 0x721   :  { %v2310_v33 = vpop.eup %2309 }
 0x722   :  { %2315 = vrcp.f32 %v1793_v32  ;;  %v1794_v34 = vadd.f32 1.0, %v2310_v33  ;;  %v2312_v35 = vpop.eup %2311 }
 0x723   :  { %v2314_v36 = vpop.eup %2313  ;;  %v1795_v40 = vadd.f32 1.0, %v2312_v35 }
 0x724   :  { %2317 = vrcp.f32 %v1794_v34 }
 0x725   :  { %2319 = vrcp.f32 %v1795_v40 }
 0x72f   :  { %v2316_v37 = vpop.eup %2315 }
 0x730   :  { %v1804_v38 = vmul.f32 %v2316_v37, %v2314_v36 }
 0x731   :  { %v2318_v39 = vpop.eup %2317 }
 0x732   :  { %v1803_v41 = vmul.f32 %v2318_v39, %v3194_v9  ;;  %v2320_v0 = vpop.eup %2319  ;;  %v3333_v9 = vsel %vm2661_vm3, %v3102_v14, %v3098_v43 }
 0x734   :  { %v1805_v42 = vadd.f32 %v1804_v38, %v1803_v41 }
 0x736   :  { %2321 = vtanh.f32 %v1805_v42 }
 0x743   :  { %v2322_v49 = vpop.eup %2321 }
 0x744   :  { %v1807_v11 = vmul.f32 %v2322_v49, %v2320_v0 }
 0x746   :  { %v1808_v61 = vpack.c.bf16 %v1807_v11, %v1807_v11 }
 0x748   :  { %1842 = vmatmul.mubr.bf16.vlgmr.msra.gmra.mxu0 %v1808_v61  ;;  %1883 = vmatmul.mubr.bf16.vlgmr.msra.gmra.mxu1 %v1808_v61 }
 0x808   :  { %v1843_v8 = vpop.f32.mrf.mxu0  ;;  %v1884_v62 = vpop.f32.mrf.mxu1 }
 0x809   :  { %v1891_v53 = vadd.f32 %v1843_v8, %v3332_v1  ;;  %v1893_v5 = vadd.f32 %v1884_v62, %v3334_v6 }
 0x80a   :  { %v1845_v54 = vpop.f32.mrf.mxu0  ;;  %v1886_v17 = vpop.f32.mrf.mxu1 }
 0x80b   :  { %v2052_v57 = vmul.f32 -1.442695, %v1891_v53  ;;  %v1892_v51 = vadd.f32 %v1845_v54, %v3333_v9  ;;  %v2054_v50 = vmul.f32 -1.442695, %v1893_v5  ;;  %v1894_v43 = vadd.f32 %v1886_v17, %v3335_v56 }
 0x80c   :  { %v1847_v47 = vpop.f32.mrf.mxu0  ;;  %v1888_v28 = vpop.f32.mrf.mxu1 }
 0x80d   :  { %2323 = vpow2.f32 %v2052_v57  ;;  %v2053_v46 = vmul.f32 -1.442695, %v1892_v51 }
 0x80e   :  { %v1848_v16 = vpop.f32.mrf.mxu0  ;;  %v1889_v29 = vpop.f32.mrf.mxu1 }
 0x80f   :  { %2325 = vpow2.f32 %v2053_v46 }
 0x810   :  { %2327 = vpow2.f32 %v2054_v50 }
 0x811   :  { %2329 = vtanh.f32 %v1894_v43 }
 0x81a   :  { %v2324_v14 = vpop.eup %2323 }
 0x81b   :  { %v1904_v63 = vadd.f32 1.0, %v2324_v14 }
 0x81c   :  { %v2326_v2 = vpop.eup %2325 }
 0x81d   :  { %2331 = vrcp.f32 %v1904_v63  ;;  %v1905_v44 = vadd.f32 1.0, %v2326_v2  ;;  %v2328_v48 = vpop.eup %2327 }
 0x81e   :  { %v2330_v59 = vpop.eup %2329  ;;  %v1906_v12 = vadd.f32 1.0, %v2328_v48 }
 0x81f   :  { %2333 = vrcp.f32 %v1905_v44 }
 0x820   :  { %2335 = vrcp.f32 %v1906_v12 }
 0x82a   :  { %v2332_v7 = vpop.eup %2331 }
 0x82b   :  { %v1915_v58 = vmul.f32 %v2332_v7, %v2330_v59 }
 0x82c   :  { %v2334_v10 = vpop.eup %2333 }
 0x82d   :  { %v1914_v13 = vmul.f32 %v2334_v10, %v1805_v42  ;;  %v2336_v4 = vpop.eup %2335 }
 0x82f   :  { %v1916_v3 = vadd.f32 %v1915_v58, %v1914_v13 }
 0x831   :  { %2337 = vtanh.f32 %v1916_v3 }
 0x83e   :  { %v2338_v19 = vpop.eup %2337 }
 0x83f   :  { %v1918_v15 = vmul.f32 %v2338_v19, %v2336_v4 }
 0x841   :  { %v1919_v55 = vsel %vm121_vm1, %v1918_v15, %v3139_v45 }
 0x842   :  { %1920 = vst [vmem:[%s3275_s7] sm:$0xff] %v1919_v55 }
 0x843   :  { %1925 = vsyncpa [#allocation3], 1 }
 0x844   :  { %1926 = vsyncpa [#allocation5], 1 }

</bundles_post_ra>
